<compile_context>
chip_gen: v7x
topology: tpu7x:2x2x1
jax: 0.10.0
libtpu: 0.0.40
codegen_flags: <defaults>
</compile_context>

<pallas_src>
import functools

import jax
import jax.numpy as jnp
from jax.experimental import pallas as pl
from jax.experimental.pallas import tpu as pltpu


def _fused_convex_upsample_kernel(g_ref, x_ref, w1t_ref, b1_ref, alpha_ref,
                                  w2t_ref, b2_ref, out_ref, xu_ref, *,
                                  UV, UVp, C, W, TM):
    """One (batch, row-tile) step: in-VMEM 3x3 unfold -> mask head -> softmax
    -> convex combination.

    g_ref   : (1, 1, CIN, LW) bf16  halo'd guide slab, flattened pixels on lanes,
                                    LW = TM + 2*W + 2 (one halo row + 1 px each side)
    x_ref   : (1, 1, C,   LW) f32   halo'd x slab
    w1t_ref : (C1, 9*CIN)     bf16  conv1 weights, transposed, im2col tap order
    b1_ref  : (C1, 1)         f32
    alpha   : (1,)            f32   PReLU parameter (SMEM scalar)
    w2t_ref : (9*UVp, C1)     f32   conv2 (1x1) weights, transposed, 0.25 folded,
                                    each tap's UV rows zero-padded to UVp (8-aligned)
    b2_ref  : (9*UVp, 1)      f32
    out_ref : (1, C*UV, TM)   f32   row = c*UV + (u*uf + v), pixels on lanes
    xu_ref  : (9*C, TM)       f32   VMEM scratch: in-kernel 3x3 unfold of x
    """
    g = g_ref[0, 0]                        # (CIN, LW) bf16
    xs = x_ref[0, 0]                       # (C,  LW) f32

    # Column-edge masks for the left / right taps.  Row edges of the image are
    # already zeroed by the padding baked into the halo slabs.
    col = jax.lax.broadcasted_iota(jnp.int32, (1, TM), 1) % W
    not_left = col != 0
    not_right = col != (W - 1)

    def tap(slab, dy, dx):
        s = dy * W + dx                    # halo slab offset of neighbor (dy-1, dx-1)
        v = slab[:, s:s + TM]
        if dx == 0:
            v = jnp.where(not_left, v, jnp.zeros_like(v))
        elif dx == 2:
            v = jnp.where(not_right, v, jnp.zeros_like(v))
        return v

    # --- in-VMEM 3x3 unfold of the guide -> ONE im2col matmul ---------------
    a = jnp.concatenate([tap(g, dy, dx) for dy in range(3) for dx in range(3)],
                        axis=0)                                   # (9*CIN, TM) bf16
    h = jnp.dot(w1t_ref[...], a, preferred_element_type=jnp.float32)
    h = h + b1_ref[...]                                           # (C1, TM) f32
    alpha = alpha_ref[0]
    h = jnp.where(h >= 0.0, h, alpha * h)                         # PReLU
    lg = jnp.dot(w2t_ref[...], h, preferred_element_type=jnp.float32)
    lg = lg + b2_ref[...]                                         # (9*UVp, TM); 0.25 folded

    # --- in-VMEM 3x3 unfold of x into scratch --------------------------------
    for dy in range(3):
        for dx in range(3):
            k = dy * 3 + dx
            xu_ref[k * C:(k + 1) * C, :] = tap(xs, dy, dx)

    # --- streaming softmax over the 9 taps + convex combination -------------
    # Pass 1: per-(offset, pixel) max over taps (8-aligned row slabs).
    mx = lg[0:UVp, :]
    for k in range(1, 9):
        mx = jnp.maximum(mx, lg[k * UVp:(k + 1) * UVp, :])

    # Pass 2: accumulate denominator and UN-normalized per-channel sums.
    den = jnp.zeros((UVp, TM), jnp.float32)
    accs = [jnp.zeros((UVp, TM), jnp.float32) for _ in range(C)]
    for k in range(9):
        e = jnp.exp(lg[k * UVp:(k + 1) * UVp, :] - mx)
        den = den + e
        for c in range(C):
            xv = xu_ref[k * C + c:k * C + c + 1, :]               # (1, TM) row
            accs[c] = accs[c] + e * xv
    inv = 1.0 / den                                               # exact, once per tile

    for c in range(C):
        out_ref[0, c * UV:(c + 1) * UV, :] = (
            accs[c][:UV, :] * inv[:UV, :]).astype(out_ref.dtype)


def _pick_row_tile(H, W, target_pixels=2048):
    """Largest TH dividing H with TH*W a multiple of 128 and <= target pixels."""
    best = None
    for th in range(1, H + 1):
        if H % th == 0 and (th * W) % 128 == 0 and th * W <= target_pixels:
            best = th
    if best is None:
        # TODO(synk): pad HW to a multiple of 128 and mask the tail instead of
        # falling back to a single whole-image tile for very large images.
        return H, 1
    return best, H // best


def convex_upsampling_forward(x, guide, params, upsample_factor):
    """x: [B, C, H, W], guide: [B, Cg, 2H, 2W] (NCHW) -> [B, C, uf*H, uf*W]."""
    B, C, H, W = x.shape
    uf = upsample_factor
    UV = uf * uf
    UVp = ((UV + 7) // 8) * 8            # per-tap logit rows, padded 8-aligned
    Cg = guide.shape[1]
    CIN = 4 * Cg
    C1 = params["w1"].shape[-1]
    K1 = 9 * CIN
    HW = H * W

    TH, nT = _pick_row_tile(H, W)
    TM = TH * W                          # pixels per tile (lanes)
    LW = TM + 2 * W + 2                  # halo: one row + one pixel on each side

    # --- cheap layout glue (no 9x duplication anywhere) ----------------------
    # space-to-depth of the guide -> [B, 4*Cg, H, W], channel-major already.
    m = jnp.concatenate(
        [guide[:, :, ::2, ::2], guide[:, :, ::2, 1::2],
         guide[:, :, 1::2, ::2], guide[:, :, 1::2, 1::2]], axis=1)
    m_flat = m.reshape(B, CIN, HW).astype(jnp.bfloat16)           # bf16 MXU operand
    x_flat = x.reshape(B, C, HW).astype(jnp.float32)

    pad = W + 1                                                   # flat-pixel halo
    m_fp = jnp.pad(m_flat, ((0, 0), (0, 0), (pad, pad)))
    x_fp = jnp.pad(x_flat, ((0, 0), (0, 0), (pad, pad)))
    g_slabs = jnp.stack([m_fp[:, :, t * TM:t * TM + LW] for t in range(nT)],
                        axis=1)                                   # [B, nT, CIN, LW]
    x_slabs = jnp.stack([x_fp[:, :, t * TM:t * TM + LW] for t in range(nT)],
                        axis=1)                                   # [B, nT, C, LW]

    # --- weights: im2col order for conv1; 0.25-folded, 8-padded conv2 --------
    w1t = params["w1"].reshape(K1, C1).T.astype(jnp.bfloat16)     # (C1, 9*CIN)
    b1c = params["b1"].reshape(C1, 1).astype(jnp.float32)
    alpha = params["alpha"].reshape(1).astype(jnp.float32)

    w2p = (0.25 * params["w2"]).T.reshape(9, UV, C1)              # tap-major rows
    w2p = jnp.pad(w2p, ((0, 0), (0, UVp - UV), (0, 0)))
    w2p = w2p.reshape(9 * UVp, C1).astype(jnp.float32)            # (9*UVp, C1)
    b2p = (0.25 * params["b2"]).reshape(9, UV)
    b2p = jnp.pad(b2p, ((0, 0), (0, UVp - UV)))
    b2p = b2p.reshape(9 * UVp, 1).astype(jnp.float32)

    grid = (B, nT)
    out_flat = pl.pallas_call(
        functools.partial(_fused_convex_upsample_kernel,
                          UV=UV, UVp=UVp, C=C, W=W, TM=TM),
        out_shape=jax.ShapeDtypeStruct((B, C * UV, HW), jnp.float32),
        grid=grid,
        in_specs=[
            pl.BlockSpec((1, 1, CIN, LW), lambda b, t: (b, t, 0, 0)),
            pl.BlockSpec((1, 1, C, LW), lambda b, t: (b, t, 0, 0)),
            pl.BlockSpec((C1, K1), lambda b, t: (0, 0)),
            pl.BlockSpec((C1, 1), lambda b, t: (0, 0)),
            pl.BlockSpec(memory_space=pltpu.MemorySpace.SMEM),    # PReLU alpha
            pl.BlockSpec((9 * UVp, C1), lambda b, t: (0, 0)),
            pl.BlockSpec((9 * UVp, 1), lambda b, t: (0, 0)),
        ],
        out_specs=pl.BlockSpec((1, C * UV, TM), lambda b, t: (b, 0, t)),
        scratch_shapes=[pltpu.VMEM((9 * C, TM), jnp.float32)],
        compiler_params=pltpu.CompilerParams(
            dimension_semantics=("parallel", "parallel"),
            vmem_limit_bytes=32 * 1024 * 1024),
    )(g_slabs, x_slabs, w1t, b1c, alpha, w2p, b2p)

    # pixel shuffle: (B, C*UV, HW) = (b, c, u, v, h, w) -> (B, C, uf*H, uf*W)
    y = out_flat.reshape(B, C, uf, uf, H, W)
    y = jnp.transpose(y, (0, 1, 4, 2, 5, 3))
    return y.reshape(B, C, uf * H, uf * W)


def reference_forward(x, guide, params, uf):
    """Pure-JAX NCHW reference mirroring the PyTorch module line by line."""
    m = jnp.concatenate(
        [guide[:, :, ::2, ::2], guide[:, :, ::2, 1::2],
         guide[:, :, 1::2, ::2], guide[:, :, 1::2, 1::2]], axis=1)
    w1_oihw = jnp.transpose(params["w1"], (3, 2, 0, 1))
    m = jax.lax.conv_general_dilated(
        m, w1_oihw, (1, 1), ((1, 1), (1, 1)),
        dimension_numbers=("NCHW", "OIHW", "NCHW"))
    m = m + params["b1"].reshape(1, -1, 1, 1)
    a = params["alpha"][0]
    m = jnp.where(m >= 0, m, a * m)
    w2_oihw = params["w2"].T.reshape(params["w2"].shape[1], params["w2"].shape[0], 1, 1)
    m = jax.lax.conv_general_dilated(
        m, w2_oihw, (1, 1), ((0, 0), (0, 0)),
        dimension_numbers=("NCHW", "OIHW", "NCHW"))
    m = 0.25 * (m + params["b2"].reshape(1, -1, 1, 1))

    B, C, H, W = x.shape
    m = m.reshape(B, 1, 9, uf, uf, H, W)
    m = jax.nn.softmax(m, axis=2)
    xp = jnp.pad(x, ((0, 0), (0, 0), (1, 1), (1, 1)))
    patches = jnp.stack([xp[:, :, dy:dy + H, dx:dx + W]
                         for dy in range(3) for dx in range(3)], axis=2)
    xu = patches.reshape(B, C, 9, 1, 1, H, W)
    out = jnp.sum(m * xu, axis=2)
    out = jnp.transpose(out, (0, 1, 4, 2, 5, 3))
    return out.reshape(B, C, uf * H, uf * W)


if __name__ == "__main__":
    def make_inputs(key, B, Cg, C, H, W, uf, C1=256):
        CIN, COUT = 4 * Cg, 9 * uf * uf
        k1, k2, k3, k4, k5, k6 = jax.random.split(key, 6)
        guide = jax.random.normal(k1, (B, Cg, 2 * H, 2 * W), jnp.float32)
        x = jax.random.normal(k2, (B, C, H, W), jnp.float32)
        params = {
            "w1": 0.05 * jax.random.normal(k3, (3, 3, CIN, C1), jnp.float32),   # conv1 (HWIO)
            "b1": 0.05 * jax.random.normal(k4, (1, C1), jnp.float32),
            "alpha": jnp.array([0.25], jnp.float32),                            # PReLU default
            "w2": 0.05 * jax.random.normal(k5, (C1, COUT), jnp.float32),        # conv2 (1x1)
            "b2": 0.05 * jax.random.normal(k6, (1, COUT), jnp.float32),
        }
        return x, guide, params

    key = jax.random.PRNGKey(0)
    k_a, k_b = jax.random.split(key)

    # Small test (single row-tile per batch element, grid = (2, 1)).
    x, guide, params = make_inputs(k_a, B=2, Cg=4, C=4, H=16, W=16, uf=2)
    out = jax.block_until_ready(convex_upsampling_forward(x, guide, params, 2))
    assert out.shape == (2, 4, 32, 32)
    ref = reference_forward(x, guide, params, 2)
    err = float(jnp.max(jnp.abs(out - ref)))
    # Matmuls run at single-pass bf16 MXU precision (inputs stored bf16), same
    # as XLA's default-precision reference conv; tolerance reflects that.
    if not bool(jnp.allclose(out, ref, atol=1e-2, rtol=1e-2)):
        raise SystemExit(f"mismatch vs reference (small), max abs err = {err}")

    # Multi-row-tile test exercising the halo tiling path (grid = (1, 2)).
    x2, guide2, params2 = make_inputs(k_b, B=1, Cg=4, C=4, H=64, W=64, uf=2)
    out2 = jax.block_until_ready(convex_upsampling_forward(x2, guide2, params2, 2))
    assert out2.shape == (1, 4, 128, 128)
    ref2 = reference_forward(x2, guide2, params2, 2)
    err2 = float(jnp.max(jnp.abs(out2 - ref2)))
    if not bool(jnp.allclose(out2, ref2, atol=2e-2, rtol=2e-2)):
        raise SystemExit(f"mismatch vs reference (tiled), max abs err = {err2}")

    print("KERNEL_OK")
</pallas_src>

<mosaic_0001>
module attributes {stable_mosaic.version = 11 : i64} {
  func.func @_fused_convex_upsample_kernel(%arg0: i32, %arg1: i32, %arg2: memref<1x1x16x290xbf16, #tpu.memory_space<vmem>>, %arg3: memref<1x1x4x290xf32, #tpu.memory_space<vmem>>, %arg4: memref<256x144xbf16, #tpu.memory_space<vmem>>, %arg5: memref<256x1xf32, #tpu.memory_space<vmem>>, %arg6: memref<1xf32, #tpu.memory_space<smem>>, %arg7: memref<72x256xf32, #tpu.memory_space<vmem>>, %arg8: memref<72x1xf32, #tpu.memory_space<vmem>>, %arg9: memref<1x16x256xf32, #tpu.memory_space<vmem>>, %arg10: memref<36x256xf32, #tpu.memory_space<vmem>>) attributes {dimension_semantics = [#tpu.dimension_semantics<parallel>, #tpu.dimension_semantics<parallel>], iteration_bounds = array<i64: 2, 1>, scalar_prefetch = 0 : i64, scratch_operands = 1 : i64, tpu.core_type = #tpu.core_type<tc>, window_params = [{transform_indices = @transform_0, window_bounds = array<i64: 1, 1, 16, 290>}, {transform_indices = @transform_1, window_bounds = array<i64: 1, 1, 4, 290>}, {pipeline_mode = #tpu.pipeline_mode<synchronous>, transform_indices = @transform_2, window_bounds = array<i64: 256, 144>}, {pipeline_mode = #tpu.pipeline_mode<synchronous>, transform_indices = @transform_3, window_bounds = array<i64: 256, 1>}, {transform_indices = @transform_4, window_bounds = array<i64: 1>}, {pipeline_mode = #tpu.pipeline_mode<synchronous>, transform_indices = @transform_5, window_bounds = array<i64: 72, 256>}, {pipeline_mode = #tpu.pipeline_mode<synchronous>, transform_indices = @transform_6, window_bounds = array<i64: 72, 1>}, {transform_indices = @transform_7, window_bounds = array<i64: 1, 16, 256>}]} {
    %c0 = arith.constant 0 : index
    %c0_0 = arith.constant 0 : index
    %c0_1 = arith.constant 0 : index
    %c0_2 = arith.constant 0 : index
    %0 = vector.load %arg2[%c0, %c0_0, %c0_1, %c0_2] : memref<1x1x16x290xbf16, #tpu.memory_space<vmem>>, vector<1x1x16x290xbf16>
    %1 = vector.shape_cast %0 : vector<1x1x16x290xbf16> to vector<16x290xbf16>
    %c0_3 = arith.constant 0 : index
    %c0_4 = arith.constant 0 : index
    %c0_5 = arith.constant 0 : index
    %c0_6 = arith.constant 0 : index
    %2 = vector.load %arg3[%c0_3, %c0_4, %c0_5, %c0_6] : memref<1x1x4x290xf32, #tpu.memory_space<vmem>>, vector<1x1x4x290xf32>
    %3 = vector.shape_cast %2 : vector<1x1x4x290xf32> to vector<4x290xf32>
    %4 = tpu.iota {dimensions = array<i32: 1>} : vector<1x256xi32>
    %c16_i32 = arith.constant 16 : i32
    %c0_i32 = arith.constant 0 : i32
    %5 = arith.cmpi eq, %c16_i32, %c0_i32 : i32
    %c1_i32 = arith.constant 1 : i32
    %6 = arith.select %5, %c1_i32, %c16_i32 : i32
    %7 = vector.broadcast %6 : i32 to vector<1x256xi32>
    %8 = arith.remsi %4, %7 : vector<1x256xi32>
    %c0_i32_7 = arith.constant 0 : i32
    %9 = vector.broadcast %c0_i32_7 : i32 to vector<1x256xi32>
    %10 = arith.cmpi ne, %8, %9 : vector<1x256xi32>
    %c0_i32_8 = arith.constant 0 : i32
    %11 = vector.broadcast %c0_i32_8 : i32 to vector<1x256xi32>
    %12 = arith.cmpi slt, %8, %11 : vector<1x256xi32>
    %c0_i32_9 = arith.constant 0 : i32
    %13 = arith.cmpi slt, %6, %c0_i32_9 : i32
    %14 = vector.broadcast %13 : i1 to vector<1x256xi1>
    %15 = vector.broadcast %14 : vector<1x256xi1> to vector<1x256xi1>
    %16 = arith.xori %12, %15 : vector<1x256xi1>
    %17 = arith.andi %16, %10 : vector<1x256xi1>
    %18 = vector.broadcast %6 : i32 to vector<1x256xi32>
    %19 = arith.addi %8, %18 : vector<1x256xi32>
    %20 = arith.select %17, %19, %8 : vector<1x256xi1>, vector<1x256xi32>
    %c0_i32_10 = arith.constant 0 : i32
    %21 = vector.broadcast %c0_i32_10 : i32 to vector<1x256xi32>
    %22 = arith.cmpi ne, %20, %21 : vector<1x256xi32>
    %c15_i32 = arith.constant 15 : i32
    %23 = vector.broadcast %c15_i32 : i32 to vector<1x256xi32>
    %24 = arith.cmpi ne, %20, %23 : vector<1x256xi32>
    %25 = vector.extract_strided_slice %1 {offsets = [0, 0], sizes = [16, 256], strides = [1, 1]} : vector<16x290xbf16> to vector<16x256xbf16>
    %cst = arith.constant 0.000000e+00 : bf16
    %26 = vector.broadcast %cst : bf16 to vector<16x256xbf16>
    %27 = vector.shape_cast %22 : vector<1x256xi1> to vector<1x256xi1>
    %28 = vector.broadcast %27 : vector<1x256xi1> to vector<16x256xi1>
    %29 = arith.select %28, %25, %26 : vector<16x256xi1>, vector<16x256xbf16>
    %30 = vector.extract_strided_slice %1 {offsets = [0, 1], sizes = [16, 256], strides = [1, 1]} : vector<16x290xbf16> to vector<16x256xbf16>
    %31 = vector.extract_strided_slice %1 {offsets = [0, 2], sizes = [16, 256], strides = [1, 1]} : vector<16x290xbf16> to vector<16x256xbf16>
    %cst_11 = arith.constant 0.000000e+00 : bf16
    %32 = vector.broadcast %cst_11 : bf16 to vector<16x256xbf16>
    %33 = vector.shape_cast %24 : vector<1x256xi1> to vector<1x256xi1>
    %34 = vector.broadcast %33 : vector<1x256xi1> to vector<16x256xi1>
    %35 = arith.select %34, %31, %32 : vector<16x256xi1>, vector<16x256xbf16>
    %36 = vector.extract_strided_slice %1 {offsets = [0, 16], sizes = [16, 256], strides = [1, 1]} : vector<16x290xbf16> to vector<16x256xbf16>
    %cst_12 = arith.constant 0.000000e+00 : bf16
    %37 = vector.broadcast %cst_12 : bf16 to vector<16x256xbf16>
    %38 = vector.shape_cast %22 : vector<1x256xi1> to vector<1x256xi1>
    %39 = vector.broadcast %38 : vector<1x256xi1> to vector<16x256xi1>
    %40 = arith.select %39, %36, %37 : vector<16x256xi1>, vector<16x256xbf16>
    %41 = vector.extract_strided_slice %1 {offsets = [0, 17], sizes = [16, 256], strides = [1, 1]} : vector<16x290xbf16> to vector<16x256xbf16>
    %42 = vector.extract_strided_slice %1 {offsets = [0, 18], sizes = [16, 256], strides = [1, 1]} : vector<16x290xbf16> to vector<16x256xbf16>
    %cst_13 = arith.constant 0.000000e+00 : bf16
    %43 = vector.broadcast %cst_13 : bf16 to vector<16x256xbf16>
    %44 = vector.shape_cast %24 : vector<1x256xi1> to vector<1x256xi1>
    %45 = vector.broadcast %44 : vector<1x256xi1> to vector<16x256xi1>
    %46 = arith.select %45, %42, %43 : vector<16x256xi1>, vector<16x256xbf16>
    %47 = vector.extract_strided_slice %1 {offsets = [0, 32], sizes = [16, 256], strides = [1, 1]} : vector<16x290xbf16> to vector<16x256xbf16>
    %cst_14 = arith.constant 0.000000e+00 : bf16
    %48 = vector.broadcast %cst_14 : bf16 to vector<16x256xbf16>
    %49 = vector.shape_cast %22 : vector<1x256xi1> to vector<1x256xi1>
    %50 = vector.broadcast %49 : vector<1x256xi1> to vector<16x256xi1>
    %51 = arith.select %50, %47, %48 : vector<16x256xi1>, vector<16x256xbf16>
    %52 = vector.extract_strided_slice %1 {offsets = [0, 33], sizes = [16, 256], strides = [1, 1]} : vector<16x290xbf16> to vector<16x256xbf16>
    %53 = vector.extract_strided_slice %1 {offsets = [0, 34], sizes = [16, 256], strides = [1, 1]} : vector<16x290xbf16> to vector<16x256xbf16>
    %cst_15 = arith.constant 0.000000e+00 : bf16
    %54 = vector.broadcast %cst_15 : bf16 to vector<16x256xbf16>
    %55 = vector.shape_cast %24 : vector<1x256xi1> to vector<1x256xi1>
    %56 = vector.broadcast %55 : vector<1x256xi1> to vector<16x256xi1>
    %57 = arith.select %56, %53, %54 : vector<16x256xi1>, vector<16x256xbf16>
    %58 = tpu.concatenate %29, %30, %35, %40, %41, %46, %51, %52, %57 in 0 : vector<16x256xbf16>, vector<16x256xbf16>, vector<16x256xbf16>, vector<16x256xbf16>, vector<16x256xbf16>, vector<16x256xbf16>, vector<16x256xbf16>, vector<16x256xbf16>, vector<16x256xbf16> -> vector<144x256xbf16>
    %c0_16 = arith.constant 0 : index
    %c0_17 = arith.constant 0 : index
    %59 = vector.load %arg4[%c0_16, %c0_17] : memref<256x144xbf16, #tpu.memory_space<vmem>>, vector<256x144xbf16>
    %cst_18 = arith.constant dense<0.000000e+00> : vector<256x256xf32>
    %60 = tpu.matmul %59, %58, %cst_18 {dimension_numbers = #tpu.dot_dimension_numbers<[1], [0], [0], [1], [0, 0, 1, 1], [], []>} : vector<256x144xbf16>, vector<144x256xbf16>, vector<256x256xf32> -> vector<256x256xf32>
    %c0_19 = arith.constant 0 : index
    %c0_20 = arith.constant 0 : index
    %61 = vector.load %arg5[%c0_19, %c0_20] : memref<256x1xf32, #tpu.memory_space<vmem>>, vector<256x1xf32>
    %62 = vector.broadcast %61 : vector<256x1xf32> to vector<256x256xf32>
    %63 = arith.addf %60, %62 : vector<256x256xf32>
    %c0_21 = arith.constant 0 : index
    %64 = memref.load %arg6[%c0_21] : memref<1xf32, #tpu.memory_space<smem>>
    %cst_22 = arith.constant 0.000000e+00 : f32
    %65 = vector.broadcast %cst_22 : f32 to vector<256x256xf32>
    %66 = arith.cmpf oge, %63, %65 : vector<256x256xf32>
    %67 = vector.broadcast %64 : f32 to vector<256x256xf32>
    %68 = arith.mulf %67, %63 : vector<256x256xf32>
    %69 = arith.select %66, %63, %68 : vector<256x256xi1>, vector<256x256xf32>
    %c0_23 = arith.constant 0 : index
    %c0_24 = arith.constant 0 : index
    %70 = vector.load %arg7[%c0_23, %c0_24] : memref<72x256xf32, #tpu.memory_space<vmem>>, vector<72x256xf32>
    %cst_25 = arith.constant dense<0.000000e+00> : vector<72x256xf32>
    %71 = tpu.matmul %70, %69, %cst_25 {dimension_numbers = #tpu.dot_dimension_numbers<[1], [0], [0], [1], [0, 0, 1, 1], [], []>} : vector<72x256xf32>, vector<256x256xf32>, vector<72x256xf32> -> vector<72x256xf32>
    %c0_26 = arith.constant 0 : index
    %c0_27 = arith.constant 0 : index
    %72 = vector.load %arg8[%c0_26, %c0_27] : memref<72x1xf32, #tpu.memory_space<vmem>>, vector<72x1xf32>
    %73 = vector.broadcast %72 : vector<72x1xf32> to vector<72x256xf32>
    %74 = arith.addf %71, %73 : vector<72x256xf32>
    %75 = vector.extract_strided_slice %3 {offsets = [0, 0], sizes = [4, 256], strides = [1, 1]} : vector<4x290xf32> to vector<4x256xf32>
    %cst_28 = arith.constant 0.000000e+00 : f32
    %76 = vector.broadcast %cst_28 : f32 to vector<4x256xf32>
    %77 = vector.shape_cast %22 : vector<1x256xi1> to vector<1x256xi1>
    %78 = vector.broadcast %77 : vector<1x256xi1> to vector<4x256xi1>
    %79 = arith.select %78, %75, %76 : vector<4x256xi1>, vector<4x256xf32>
    %c0_29 = arith.constant 0 : index
    %c0_30 = arith.constant 0 : index
    %80 = vector.load %arg10[%c0_29, %c0_30] : memref<36x256xf32, #tpu.memory_space<vmem>>, vector<4x256xf32>
    tpu.vector_store %arg10[%c0_29, %c0_30], %79 {strides = array<i32>} : memref<36x256xf32, #tpu.memory_space<vmem>>, vector<4x256xf32>,
    %81 = vector.extract_strided_slice %3 {offsets = [0, 1], sizes = [4, 256], strides = [1, 1]} : vector<4x290xf32> to vector<4x256xf32>
    %c4 = arith.constant 4 : index
    %c0_31 = arith.constant 0 : index
    %82 = vector.load %arg10[%c4, %c0_31] : memref<36x256xf32, #tpu.memory_space<vmem>>, vector<4x256xf32>
    tpu.vector_store %arg10[%c4, %c0_31], %81 {strides = array<i32>} : memref<36x256xf32, #tpu.memory_space<vmem>>, vector<4x256xf32>,
    %83 = vector.extract_strided_slice %3 {offsets = [0, 2], sizes = [4, 256], strides = [1, 1]} : vector<4x290xf32> to vector<4x256xf32>
    %cst_32 = arith.constant 0.000000e+00 : f32
    %84 = vector.broadcast %cst_32 : f32 to vector<4x256xf32>
    %85 = vector.shape_cast %24 : vector<1x256xi1> to vector<1x256xi1>
    %86 = vector.broadcast %85 : vector<1x256xi1> to vector<4x256xi1>
    %87 = arith.select %86, %83, %84 : vector<4x256xi1>, vector<4x256xf32>
    %c8 = arith.constant 8 : index
    %c0_33 = arith.constant 0 : index
    %88 = vector.load %arg10[%c8, %c0_33] : memref<36x256xf32, #tpu.memory_space<vmem>>, vector<4x256xf32>
    tpu.vector_store %arg10[%c8, %c0_33], %87 {strides = array<i32>} : memref<36x256xf32, #tpu.memory_space<vmem>>, vector<4x256xf32>,
    %89 = vector.extract_strided_slice %3 {offsets = [0, 16], sizes = [4, 256], strides = [1, 1]} : vector<4x290xf32> to vector<4x256xf32>
    %cst_34 = arith.constant 0.000000e+00 : f32
    %90 = vector.broadcast %cst_34 : f32 to vector<4x256xf32>
    %91 = vector.shape_cast %22 : vector<1x256xi1> to vector<1x256xi1>
    %92 = vector.broadcast %91 : vector<1x256xi1> to vector<4x256xi1>
    %93 = arith.select %92, %89, %90 : vector<4x256xi1>, vector<4x256xf32>
    %c12 = arith.constant 12 : index
    %c0_35 = arith.constant 0 : index
    %94 = vector.load %arg10[%c12, %c0_35] : memref<36x256xf32, #tpu.memory_space<vmem>>, vector<4x256xf32>
    tpu.vector_store %arg10[%c12, %c0_35], %93 {strides = array<i32>} : memref<36x256xf32, #tpu.memory_space<vmem>>, vector<4x256xf32>,
    %95 = vector.extract_strided_slice %3 {offsets = [0, 17], sizes = [4, 256], strides = [1, 1]} : vector<4x290xf32> to vector<4x256xf32>
    %c16 = arith.constant 16 : index
    %c0_36 = arith.constant 0 : index
    %96 = vector.load %arg10[%c16, %c0_36] : memref<36x256xf32, #tpu.memory_space<vmem>>, vector<4x256xf32>
    tpu.vector_store %arg10[%c16, %c0_36], %95 {strides = array<i32>} : memref<36x256xf32, #tpu.memory_space<vmem>>, vector<4x256xf32>,
    %97 = vector.extract_strided_slice %3 {offsets = [0, 18], sizes = [4, 256], strides = [1, 1]} : vector<4x290xf32> to vector<4x256xf32>
    %cst_37 = arith.constant 0.000000e+00 : f32
    %98 = vector.broadcast %cst_37 : f32 to vector<4x256xf32>
    %99 = vector.shape_cast %24 : vector<1x256xi1> to vector<1x256xi1>
    %100 = vector.broadcast %99 : vector<1x256xi1> to vector<4x256xi1>
    %101 = arith.select %100, %97, %98 : vector<4x256xi1>, vector<4x256xf32>
    %c20 = arith.constant 20 : index
    %c0_38 = arith.constant 0 : index
    %102 = vector.load %arg10[%c20, %c0_38] : memref<36x256xf32, #tpu.memory_space<vmem>>, vector<4x256xf32>
    tpu.vector_store %arg10[%c20, %c0_38], %101 {strides = array<i32>} : memref<36x256xf32, #tpu.memory_space<vmem>>, vector<4x256xf32>,
    %103 = vector.extract_strided_slice %3 {offsets = [0, 32], sizes = [4, 256], strides = [1, 1]} : vector<4x290xf32> to vector<4x256xf32>
    %cst_39 = arith.constant 0.000000e+00 : f32
    %104 = vector.broadcast %cst_39 : f32 to vector<4x256xf32>
    %105 = vector.shape_cast %22 : vector<1x256xi1> to vector<1x256xi1>
    %106 = vector.broadcast %105 : vector<1x256xi1> to vector<4x256xi1>
    %107 = arith.select %106, %103, %104 : vector<4x256xi1>, vector<4x256xf32>
    %c24 = arith.constant 24 : index
    %c0_40 = arith.constant 0 : index
    %108 = vector.load %arg10[%c24, %c0_40] : memref<36x256xf32, #tpu.memory_space<vmem>>, vector<4x256xf32>
    tpu.vector_store %arg10[%c24, %c0_40], %107 {strides = array<i32>} : memref<36x256xf32, #tpu.memory_space<vmem>>, vector<4x256xf32>,
    %109 = vector.extract_strided_slice %3 {offsets = [0, 33], sizes = [4, 256], strides = [1, 1]} : vector<4x290xf32> to vector<4x256xf32>
    %c28 = arith.constant 28 : index
    %c0_41 = arith.constant 0 : index
    %110 = vector.load %arg10[%c28, %c0_41] : memref<36x256xf32, #tpu.memory_space<vmem>>, vector<4x256xf32>
    tpu.vector_store %arg10[%c28, %c0_41], %109 {strides = array<i32>} : memref<36x256xf32, #tpu.memory_space<vmem>>, vector<4x256xf32>,
    %111 = vector.extract_strided_slice %3 {offsets = [0, 34], sizes = [4, 256], strides = [1, 1]} : vector<4x290xf32> to vector<4x256xf32>
    %cst_42 = arith.constant 0.000000e+00 : f32
    %112 = vector.broadcast %cst_42 : f32 to vector<4x256xf32>
    %113 = vector.shape_cast %24 : vector<1x256xi1> to vector<1x256xi1>
    %114 = vector.broadcast %113 : vector<1x256xi1> to vector<4x256xi1>
    %115 = arith.select %114, %111, %112 : vector<4x256xi1>, vector<4x256xf32>
    %c32 = arith.constant 32 : index
    %c0_43 = arith.constant 0 : index
    %116 = vector.load %arg10[%c32, %c0_43] : memref<36x256xf32, #tpu.memory_space<vmem>>, vector<4x256xf32>
    tpu.vector_store %arg10[%c32, %c0_43], %115 {strides = array<i32>} : memref<36x256xf32, #tpu.memory_space<vmem>>, vector<4x256xf32>,
    %117 = vector.extract_strided_slice %74 {offsets = [0, 0], sizes = [8, 256], strides = [1, 1]} : vector<72x256xf32> to vector<8x256xf32>
    %118 = vector.extract_strided_slice %74 {offsets = [8, 0], sizes = [8, 256], strides = [1, 1]} : vector<72x256xf32> to vector<8x256xf32>
    %119 = arith.maximumf %117, %118 : vector<8x256xf32>
    %120 = vector.extract_strided_slice %74 {offsets = [16, 0], sizes = [8, 256], strides = [1, 1]} : vector<72x256xf32> to vector<8x256xf32>
    %121 = arith.maximumf %119, %120 : vector<8x256xf32>
    %122 = vector.extract_strided_slice %74 {offsets = [24, 0], sizes = [8, 256], strides = [1, 1]} : vector<72x256xf32> to vector<8x256xf32>
    %123 = arith.maximumf %121, %122 : vector<8x256xf32>
    %124 = vector.extract_strided_slice %74 {offsets = [32, 0], sizes = [8, 256], strides = [1, 1]} : vector<72x256xf32> to vector<8x256xf32>
    %125 = arith.maximumf %123, %124 : vector<8x256xf32>
    %126 = vector.extract_strided_slice %74 {offsets = [40, 0], sizes = [8, 256], strides = [1, 1]} : vector<72x256xf32> to vector<8x256xf32>
    %127 = arith.maximumf %125, %126 : vector<8x256xf32>
    %128 = vector.extract_strided_slice %74 {offsets = [48, 0], sizes = [8, 256], strides = [1, 1]} : vector<72x256xf32> to vector<8x256xf32>
    %129 = arith.maximumf %127, %128 : vector<8x256xf32>
    %130 = vector.extract_strided_slice %74 {offsets = [56, 0], sizes = [8, 256], strides = [1, 1]} : vector<72x256xf32> to vector<8x256xf32>
    %131 = arith.maximumf %129, %130 : vector<8x256xf32>
    %132 = vector.extract_strided_slice %74 {offsets = [64, 0], sizes = [8, 256], strides = [1, 1]} : vector<72x256xf32> to vector<8x256xf32>
    %133 = arith.maximumf %131, %132 : vector<8x256xf32>
    %cst_44 = arith.constant 0.000000e+00 : f32
    %134 = vector.broadcast %cst_44 : f32 to vector<8x256xf32>
    %cst_45 = arith.constant 0.000000e+00 : f32
    %135 = vector.broadcast %cst_45 : f32 to vector<8x256xf32>
    %cst_46 = arith.constant 0.000000e+00 : f32
    %136 = vector.broadcast %cst_46 : f32 to vector<8x256xf32>
    %cst_47 = arith.constant 0.000000e+00 : f32
    %137 = vector.broadcast %cst_47 : f32 to vector<8x256xf32>
    %cst_48 = arith.constant 0.000000e+00 : f32
    %138 = vector.broadcast %cst_48 : f32 to vector<8x256xf32>
    %139 = vector.extract_strided_slice %74 {offsets = [0, 0], sizes = [8, 256], strides = [1, 1]} : vector<72x256xf32> to vector<8x256xf32>
    %140 = arith.subf %139, %133 : vector<8x256xf32>
    %141 = math.exp %140 : vector<8x256xf32>
    %142 = arith.addf %134, %141 : vector<8x256xf32>
    %c0_49 = arith.constant 0 : index
    %c0_50 = arith.constant 0 : index
    %143 = vector.load %arg10[%c0_49, %c0_50] : memref<36x256xf32, #tpu.memory_space<vmem>>, vector<1x256xf32>
    %144 = vector.broadcast %143 : vector<1x256xf32> to vector<8x256xf32>
    %145 = arith.mulf %141, %144 : vector<8x256xf32>
    %146 = arith.addf %135, %145 : vector<8x256xf32>
    %c1 = arith.constant 1 : index
    %c0_51 = arith.constant 0 : index
    %147 = vector.load %arg10[%c1, %c0_51] : memref<36x256xf32, #tpu.memory_space<vmem>>, vector<1x256xf32>
    %148 = vector.broadcast %147 : vector<1x256xf32> to vector<8x256xf32>
    %149 = arith.mulf %141, %148 : vector<8x256xf32>
    %150 = arith.addf %136, %149 : vector<8x256xf32>
    %c2 = arith.constant 2 : index
    %c0_52 = arith.constant 0 : index
    %151 = vector.load %arg10[%c2, %c0_52] : memref<36x256xf32, #tpu.memory_space<vmem>>, vector<1x256xf32>
    %152 = vector.broadcast %151 : vector<1x256xf32> to vector<8x256xf32>
    %153 = arith.mulf %141, %152 : vector<8x256xf32>
    %154 = arith.addf %137, %153 : vector<8x256xf32>
    %c3 = arith.constant 3 : index
    %c0_53 = arith.constant 0 : index
    %155 = vector.load %arg10[%c3, %c0_53] : memref<36x256xf32, #tpu.memory_space<vmem>>, vector<1x256xf32>
    %156 = vector.broadcast %155 : vector<1x256xf32> to vector<8x256xf32>
    %157 = arith.mulf %141, %156 : vector<8x256xf32>
    %158 = arith.addf %138, %157 : vector<8x256xf32>
    %159 = vector.extract_strided_slice %74 {offsets = [8, 0], sizes = [8, 256], strides = [1, 1]} : vector<72x256xf32> to vector<8x256xf32>
    %160 = arith.subf %159, %133 : vector<8x256xf32>
    %161 = math.exp %160 : vector<8x256xf32>
    %162 = arith.addf %142, %161 : vector<8x256xf32>
    %c4_54 = arith.constant 4 : index
    %c0_55 = arith.constant 0 : index
    %163 = vector.load %arg10[%c4_54, %c0_55] : memref<36x256xf32, #tpu.memory_space<vmem>>, vector<1x256xf32>
    %164 = vector.broadcast %163 : vector<1x256xf32> to vector<8x256xf32>
    %165 = arith.mulf %161, %164 : vector<8x256xf32>
    %166 = arith.addf %146, %165 : vector<8x256xf32>
    %c5 = arith.constant 5 : index
    %c0_56 = arith.constant 0 : index
    %167 = vector.load %arg10[%c5, %c0_56] : memref<36x256xf32, #tpu.memory_space<vmem>>, vector<1x256xf32>
    %168 = vector.broadcast %167 : vector<1x256xf32> to vector<8x256xf32>
    %169 = arith.mulf %161, %168 : vector<8x256xf32>
    %170 = arith.addf %150, %169 : vector<8x256xf32>
    %c6 = arith.constant 6 : index
    %c0_57 = arith.constant 0 : index
    %171 = vector.load %arg10[%c6, %c0_57] : memref<36x256xf32, #tpu.memory_space<vmem>>, vector<1x256xf32>
    %172 = vector.broadcast %171 : vector<1x256xf32> to vector<8x256xf32>
    %173 = arith.mulf %161, %172 : vector<8x256xf32>
    %174 = arith.addf %154, %173 : vector<8x256xf32>
    %c7 = arith.constant 7 : index
    %c0_58 = arith.constant 0 : index
    %175 = vector.load %arg10[%c7, %c0_58] : memref<36x256xf32, #tpu.memory_space<vmem>>, vector<1x256xf32>
    %176 = vector.broadcast %175 : vector<1x256xf32> to vector<8x256xf32>
    %177 = arith.mulf %161, %176 : vector<8x256xf32>
    %178 = arith.addf %158, %177 : vector<8x256xf32>
    %179 = vector.extract_strided_slice %74 {offsets = [16, 0], sizes = [8, 256], strides = [1, 1]} : vector<72x256xf32> to vector<8x256xf32>
    %180 = arith.subf %179, %133 : vector<8x256xf32>
    %181 = math.exp %180 : vector<8x256xf32>
    %182 = arith.addf %162, %181 : vector<8x256xf32>
    %c8_59 = arith.constant 8 : index
    %c0_60 = arith.constant 0 : index
    %183 = vector.load %arg10[%c8_59, %c0_60] : memref<36x256xf32, #tpu.memory_space<vmem>>, vector<1x256xf32>
    %184 = vector.broadcast %183 : vector<1x256xf32> to vector<8x256xf32>
    %185 = arith.mulf %181, %184 : vector<8x256xf32>
    %186 = arith.addf %166, %185 : vector<8x256xf32>
    %c9 = arith.constant 9 : index
    %c0_61 = arith.constant 0 : index
    %187 = vector.load %arg10[%c9, %c0_61] : memref<36x256xf32, #tpu.memory_space<vmem>>, vector<1x256xf32>
    %188 = vector.broadcast %187 : vector<1x256xf32> to vector<8x256xf32>
    %189 = arith.mulf %181, %188 : vector<8x256xf32>
    %190 = arith.addf %170, %189 : vector<8x256xf32>
    %c10 = arith.constant 10 : index
    %c0_62 = arith.constant 0 : index
    %191 = vector.load %arg10[%c10, %c0_62] : memref<36x256xf32, #tpu.memory_space<vmem>>, vector<1x256xf32>
    %192 = vector.broadcast %191 : vector<1x256xf32> to vector<8x256xf32>
    %193 = arith.mulf %181, %192 : vector<8x256xf32>
    %194 = arith.addf %174, %193 : vector<8x256xf32>
    %c11 = arith.constant 11 : index
    %c0_63 = arith.constant 0 : index
    %195 = vector.load %arg10[%c11, %c0_63] : memref<36x256xf32, #tpu.memory_space<vmem>>, vector<1x256xf32>
    %196 = vector.broadcast %195 : vector<1x256xf32> to vector<8x256xf32>
    %197 = arith.mulf %181, %196 : vector<8x256xf32>
    %198 = arith.addf %178, %197 : vector<8x256xf32>
    %199 = vector.extract_strided_slice %74 {offsets = [24, 0], sizes = [8, 256], strides = [1, 1]} : vector<72x256xf32> to vector<8x256xf32>
    %200 = arith.subf %199, %133 : vector<8x256xf32>
    %201 = math.exp %200 : vector<8x256xf32>
    %202 = arith.addf %182, %201 : vector<8x256xf32>
    %c12_64 = arith.constant 12 : index
    %c0_65 = arith.constant 0 : index
    %203 = vector.load %arg10[%c12_64, %c0_65] : memref<36x256xf32, #tpu.memory_space<vmem>>, vector<1x256xf32>
    %204 = vector.broadcast %203 : vector<1x256xf32> to vector<8x256xf32>
    %205 = arith.mulf %201, %204 : vector<8x256xf32>
    %206 = arith.addf %186, %205 : vector<8x256xf32>
    %c13 = arith.constant 13 : index
    %c0_66 = arith.constant 0 : index
    %207 = vector.load %arg10[%c13, %c0_66] : memref<36x256xf32, #tpu.memory_space<vmem>>, vector<1x256xf32>
    %208 = vector.broadcast %207 : vector<1x256xf32> to vector<8x256xf32>
    %209 = arith.mulf %201, %208 : vector<8x256xf32>
    %210 = arith.addf %190, %209 : vector<8x256xf32>
    %c14 = arith.constant 14 : index
    %c0_67 = arith.constant 0 : index
    %211 = vector.load %arg10[%c14, %c0_67] : memref<36x256xf32, #tpu.memory_space<vmem>>, vector<1x256xf32>
    %212 = vector.broadcast %211 : vector<1x256xf32> to vector<8x256xf32>
    %213 = arith.mulf %201, %212 : vector<8x256xf32>
    %214 = arith.addf %194, %213 : vector<8x256xf32>
    %c15 = arith.constant 15 : index
    %c0_68 = arith.constant 0 : index
    %215 = vector.load %arg10[%c15, %c0_68] : memref<36x256xf32, #tpu.memory_space<vmem>>, vector<1x256xf32>
    %216 = vector.broadcast %215 : vector<1x256xf32> to vector<8x256xf32>
    %217 = arith.mulf %201, %216 : vector<8x256xf32>
    %218 = arith.addf %198, %217 : vector<8x256xf32>
    %219 = vector.extract_strided_slice %74 {offsets = [32, 0], sizes = [8, 256], strides = [1, 1]} : vector<72x256xf32> to vector<8x256xf32>
    %220 = arith.subf %219, %133 : vector<8x256xf32>
    %221 = math.exp %220 : vector<8x256xf32>
    %222 = arith.addf %202, %221 : vector<8x256xf32>
    %c16_69 = arith.constant 16 : index
    %c0_70 = arith.constant 0 : index
    %223 = vector.load %arg10[%c16_69, %c0_70] : memref<36x256xf32, #tpu.memory_space<vmem>>, vector<1x256xf32>
    %224 = vector.broadcast %223 : vector<1x256xf32> to vector<8x256xf32>
    %225 = arith.mulf %221, %224 : vector<8x256xf32>
    %226 = arith.addf %206, %225 : vector<8x256xf32>
    %c17 = arith.constant 17 : index
    %c0_71 = arith.constant 0 : index
    %227 = vector.load %arg10[%c17, %c0_71] : memref<36x256xf32, #tpu.memory_space<vmem>>, vector<1x256xf32>
    %228 = vector.broadcast %227 : vector<1x256xf32> to vector<8x256xf32>
    %229 = arith.mulf %221, %228 : vector<8x256xf32>
    %230 = arith.addf %210, %229 : vector<8x256xf32>
    %c18 = arith.constant 18 : index
    %c0_72 = arith.constant 0 : index
    %231 = vector.load %arg10[%c18, %c0_72] : memref<36x256xf32, #tpu.memory_space<vmem>>, vector<1x256xf32>
    %232 = vector.broadcast %231 : vector<1x256xf32> to vector<8x256xf32>
    %233 = arith.mulf %221, %232 : vector<8x256xf32>
    %234 = arith.addf %214, %233 : vector<8x256xf32>
    %c19 = arith.constant 19 : index
    %c0_73 = arith.constant 0 : index
    %235 = vector.load %arg10[%c19, %c0_73] : memref<36x256xf32, #tpu.memory_space<vmem>>, vector<1x256xf32>
    %236 = vector.broadcast %235 : vector<1x256xf32> to vector<8x256xf32>
    %237 = arith.mulf %221, %236 : vector<8x256xf32>
    %238 = arith.addf %218, %237 : vector<8x256xf32>
    %239 = vector.extract_strided_slice %74 {offsets = [40, 0], sizes = [8, 256], strides = [1, 1]} : vector<72x256xf32> to vector<8x256xf32>
    %240 = arith.subf %239, %133 : vector<8x256xf32>
    %241 = math.exp %240 : vector<8x256xf32>
    %242 = arith.addf %222, %241 : vector<8x256xf32>
    %c20_74 = arith.constant 20 : index
    %c0_75 = arith.constant 0 : index
    %243 = vector.load %arg10[%c20_74, %c0_75] : memref<36x256xf32, #tpu.memory_space<vmem>>, vector<1x256xf32>
    %244 = vector.broadcast %243 : vector<1x256xf32> to vector<8x256xf32>
    %245 = arith.mulf %241, %244 : vector<8x256xf32>
    %246 = arith.addf %226, %245 : vector<8x256xf32>
    %c21 = arith.constant 21 : index
    %c0_76 = arith.constant 0 : index
    %247 = vector.load %arg10[%c21, %c0_76] : memref<36x256xf32, #tpu.memory_space<vmem>>, vector<1x256xf32>
    %248 = vector.broadcast %247 : vector<1x256xf32> to vector<8x256xf32>
    %249 = arith.mulf %241, %248 : vector<8x256xf32>
    %250 = arith.addf %230, %249 : vector<8x256xf32>
    %c22 = arith.constant 22 : index
    %c0_77 = arith.constant 0 : index
    %251 = vector.load %arg10[%c22, %c0_77] : memref<36x256xf32, #tpu.memory_space<vmem>>, vector<1x256xf32>
    %252 = vector.broadcast %251 : vector<1x256xf32> to vector<8x256xf32>
    %253 = arith.mulf %241, %252 : vector<8x256xf32>
    %254 = arith.addf %234, %253 : vector<8x256xf32>
    %c23 = arith.constant 23 : index
    %c0_78 = arith.constant 0 : index
    %255 = vector.load %arg10[%c23, %c0_78] : memref<36x256xf32, #tpu.memory_space<vmem>>, vector<1x256xf32>
    %256 = vector.broadcast %255 : vector<1x256xf32> to vector<8x256xf32>
    %257 = arith.mulf %241, %256 : vector<8x256xf32>
    %258 = arith.addf %238, %257 : vector<8x256xf32>
    %259 = vector.extract_strided_slice %74 {offsets = [48, 0], sizes = [8, 256], strides = [1, 1]} : vector<72x256xf32> to vector<8x256xf32>
    %260 = arith.subf %259, %133 : vector<8x256xf32>
    %261 = math.exp %260 : vector<8x256xf32>
    %262 = arith.addf %242, %261 : vector<8x256xf32>
    %c24_79 = arith.constant 24 : index
    %c0_80 = arith.constant 0 : index
    %263 = vector.load %arg10[%c24_79, %c0_80] : memref<36x256xf32, #tpu.memory_space<vmem>>, vector<1x256xf32>
    %264 = vector.broadcast %263 : vector<1x256xf32> to vector<8x256xf32>
    %265 = arith.mulf %261, %264 : vector<8x256xf32>
    %266 = arith.addf %246, %265 : vector<8x256xf32>
    %c25 = arith.constant 25 : index
    %c0_81 = arith.constant 0 : index
    %267 = vector.load %arg10[%c25, %c0_81] : memref<36x256xf32, #tpu.memory_space<vmem>>, vector<1x256xf32>
    %268 = vector.broadcast %267 : vector<1x256xf32> to vector<8x256xf32>
    %269 = arith.mulf %261, %268 : vector<8x256xf32>
    %270 = arith.addf %250, %269 : vector<8x256xf32>
    %c26 = arith.constant 26 : index
    %c0_82 = arith.constant 0 : index
    %271 = vector.load %arg10[%c26, %c0_82] : memref<36x256xf32, #tpu.memory_space<vmem>>, vector<1x256xf32>
    %272 = vector.broadcast %271 : vector<1x256xf32> to vector<8x256xf32>
    %273 = arith.mulf %261, %272 : vector<8x256xf32>
    %274 = arith.addf %254, %273 : vector<8x256xf32>
    %c27 = arith.constant 27 : index
    %c0_83 = arith.constant 0 : index
    %275 = vector.load %arg10[%c27, %c0_83] : memref<36x256xf32, #tpu.memory_space<vmem>>, vector<1x256xf32>
    %276 = vector.broadcast %275 : vector<1x256xf32> to vector<8x256xf32>
    %277 = arith.mulf %261, %276 : vector<8x256xf32>
    %278 = arith.addf %258, %277 : vector<8x256xf32>
    %279 = vector.extract_strided_slice %74 {offsets = [56, 0], sizes = [8, 256], strides = [1, 1]} : vector<72x256xf32> to vector<8x256xf32>
    %280 = arith.subf %279, %133 : vector<8x256xf32>
    %281 = math.exp %280 : vector<8x256xf32>
    %282 = arith.addf %262, %281 : vector<8x256xf32>
    %c28_84 = arith.constant 28 : index
    %c0_85 = arith.constant 0 : index
    %283 = vector.load %arg10[%c28_84, %c0_85] : memref<36x256xf32, #tpu.memory_space<vmem>>, vector<1x256xf32>
    %284 = vector.broadcast %283 : vector<1x256xf32> to vector<8x256xf32>
    %285 = arith.mulf %281, %284 : vector<8x256xf32>
    %286 = arith.addf %266, %285 : vector<8x256xf32>
    %c29 = arith.constant 29 : index
    %c0_86 = arith.constant 0 : index
    %287 = vector.load %arg10[%c29, %c0_86] : memref<36x256xf32, #tpu.memory_space<vmem>>, vector<1x256xf32>
    %288 = vector.broadcast %287 : vector<1x256xf32> to vector<8x256xf32>
    %289 = arith.mulf %281, %288 : vector<8x256xf32>
    %290 = arith.addf %270, %289 : vector<8x256xf32>
    %c30 = arith.constant 30 : index
    %c0_87 = arith.constant 0 : index
    %291 = vector.load %arg10[%c30, %c0_87] : memref<36x256xf32, #tpu.memory_space<vmem>>, vector<1x256xf32>
    %292 = vector.broadcast %291 : vector<1x256xf32> to vector<8x256xf32>
    %293 = arith.mulf %281, %292 : vector<8x256xf32>
    %294 = arith.addf %274, %293 : vector<8x256xf32>
    %c31 = arith.constant 31 : index
    %c0_88 = arith.constant 0 : index
    %295 = vector.load %arg10[%c31, %c0_88] : memref<36x256xf32, #tpu.memory_space<vmem>>, vector<1x256xf32>
    %296 = vector.broadcast %295 : vector<1x256xf32> to vector<8x256xf32>
    %297 = arith.mulf %281, %296 : vector<8x256xf32>
    %298 = arith.addf %278, %297 : vector<8x256xf32>
    %299 = vector.extract_strided_slice %74 {offsets = [64, 0], sizes = [8, 256], strides = [1, 1]} : vector<72x256xf32> to vector<8x256xf32>
    %300 = arith.subf %299, %133 : vector<8x256xf32>
    %301 = math.exp %300 : vector<8x256xf32>
    %302 = arith.addf %282, %301 : vector<8x256xf32>
    %c32_89 = arith.constant 32 : index
    %c0_90 = arith.constant 0 : index
    %303 = vector.load %arg10[%c32_89, %c0_90] : memref<36x256xf32, #tpu.memory_space<vmem>>, vector<1x256xf32>
    %304 = vector.broadcast %303 : vector<1x256xf32> to vector<8x256xf32>
    %305 = arith.mulf %301, %304 : vector<8x256xf32>
    %306 = arith.addf %286, %305 : vector<8x256xf32>
    %c33 = arith.constant 33 : index
    %c0_91 = arith.constant 0 : index
    %307 = vector.load %arg10[%c33, %c0_91] : memref<36x256xf32, #tpu.memory_space<vmem>>, vector<1x256xf32>
    %308 = vector.broadcast %307 : vector<1x256xf32> to vector<8x256xf32>
    %309 = arith.mulf %301, %308 : vector<8x256xf32>
    %310 = arith.addf %290, %309 : vector<8x256xf32>
    %c34 = arith.constant 34 : index
    %c0_92 = arith.constant 0 : index
    %311 = vector.load %arg10[%c34, %c0_92] : memref<36x256xf32, #tpu.memory_space<vmem>>, vector<1x256xf32>
    %312 = vector.broadcast %311 : vector<1x256xf32> to vector<8x256xf32>
    %313 = arith.mulf %301, %312 : vector<8x256xf32>
    %314 = arith.addf %294, %313 : vector<8x256xf32>
    %c35 = arith.constant 35 : index
    %c0_93 = arith.constant 0 : index
    %315 = vector.load %arg10[%c35, %c0_93] : memref<36x256xf32, #tpu.memory_space<vmem>>, vector<1x256xf32>
    %316 = vector.broadcast %315 : vector<1x256xf32> to vector<8x256xf32>
    %317 = arith.mulf %301, %316 : vector<8x256xf32>
    %318 = arith.addf %298, %317 : vector<8x256xf32>
    %cst_94 = arith.constant 1.000000e+00 : f32
    %319 = vector.broadcast %cst_94 : f32 to vector<8x256xf32>
    %320 = arith.divf %319, %302 : vector<8x256xf32>
    %321 = vector.extract_strided_slice %306 {offsets = [0, 0], sizes = [4, 256], strides = [1, 1]} : vector<8x256xf32> to vector<4x256xf32>
    %322 = vector.extract_strided_slice %320 {offsets = [0, 0], sizes = [4, 256], strides = [1, 1]} : vector<8x256xf32> to vector<4x256xf32>
    %323 = arith.mulf %321, %322 : vector<4x256xf32>
    %c0_95 = arith.constant 0 : index
    %c0_96 = arith.constant 0 : index
    %c0_97 = arith.constant 0 : index
    %324 = vector.load %arg9[%c0_95, %c0_96, %c0_97] : memref<1x16x256xf32, #tpu.memory_space<vmem>>, vector<1x4x256xf32>
    %325 = vector.shape_cast %324 : vector<1x4x256xf32> to vector<4x256xf32>
    %326 = vector.shape_cast %323 : vector<4x256xf32> to vector<1x4x256xf32>
    tpu.vector_store %arg9[%c0_95, %c0_96, %c0_97], %326 {strides = array<i32>} : memref<1x16x256xf32, #tpu.memory_space<vmem>>, vector<1x4x256xf32>,
    %327 = vector.extract_strided_slice %310 {offsets = [0, 0], sizes = [4, 256], strides = [1, 1]} : vector<8x256xf32> to vector<4x256xf32>
    %328 = vector.extract_strided_slice %320 {offsets = [0, 0], sizes = [4, 256], strides = [1, 1]} : vector<8x256xf32> to vector<4x256xf32>
    %329 = arith.mulf %327, %328 : vector<4x256xf32>
    %c0_98 = arith.constant 0 : index
    %c4_99 = arith.constant 4 : index
    %c0_100 = arith.constant 0 : index
    %330 = vector.load %arg9[%c0_98, %c4_99, %c0_100] : memref<1x16x256xf32, #tpu.memory_space<vmem>>, vector<1x4x256xf32>
    %331 = vector.shape_cast %330 : vector<1x4x256xf32> to vector<4x256xf32>
    %332 = vector.shape_cast %329 : vector<4x256xf32> to vector<1x4x256xf32>
    tpu.vector_store %arg9[%c0_98, %c4_99, %c0_100], %332 {strides = array<i32>} : memref<1x16x256xf32, #tpu.memory_space<vmem>>, vector<1x4x256xf32>,
    %333 = vector.extract_strided_slice %314 {offsets = [0, 0], sizes = [4, 256], strides = [1, 1]} : vector<8x256xf32> to vector<4x256xf32>
    %334 = vector.extract_strided_slice %320 {offsets = [0, 0], sizes = [4, 256], strides = [1, 1]} : vector<8x256xf32> to vector<4x256xf32>
    %335 = arith.mulf %333, %334 : vector<4x256xf32>
    %c0_101 = arith.constant 0 : index
    %c8_102 = arith.constant 8 : index
    %c0_103 = arith.constant 0 : index
    %336 = vector.load %arg9[%c0_101, %c8_102, %c0_103] : memref<1x16x256xf32, #tpu.memory_space<vmem>>, vector<1x4x256xf32>
    %337 = vector.shape_cast %336 : vector<1x4x256xf32> to vector<4x256xf32>
    %338 = vector.shape_cast %335 : vector<4x256xf32> to vector<1x4x256xf32>
    tpu.vector_store %arg9[%c0_101, %c8_102, %c0_103], %338 {strides = array<i32>} : memref<1x16x256xf32, #tpu.memory_space<vmem>>, vector<1x4x256xf32>,
    %339 = vector.extract_strided_slice %318 {offsets = [0, 0], sizes = [4, 256], strides = [1, 1]} : vector<8x256xf32> to vector<4x256xf32>
    %340 = vector.extract_strided_slice %320 {offsets = [0, 0], sizes = [4, 256], strides = [1, 1]} : vector<8x256xf32> to vector<4x256xf32>
    %341 = arith.mulf %339, %340 : vector<4x256xf32>
    %c0_104 = arith.constant 0 : index
    %c12_105 = arith.constant 12 : index
    %c0_106 = arith.constant 0 : index
    %342 = vector.load %arg9[%c0_104, %c12_105, %c0_106] : memref<1x16x256xf32, #tpu.memory_space<vmem>>, vector<1x4x256xf32>
    %343 = vector.shape_cast %342 : vector<1x4x256xf32> to vector<4x256xf32>
    %344 = vector.shape_cast %341 : vector<4x256xf32> to vector<1x4x256xf32>
    tpu.vector_store %arg9[%c0_104, %c12_105, %c0_106], %344 {strides = array<i32>} : memref<1x16x256xf32, #tpu.memory_space<vmem>>, vector<1x4x256xf32>,
    return
  }
  func.func @transform_0(%arg0: i32, %arg1: i32) -> (i32, i32, i32, i32) {
    %c0_i32 = arith.constant 0 : i32
    %c0_i32_0 = arith.constant 0 : i32
    %c0_i32_1 = arith.constant 0 : i32
    return %arg0, %arg1, %c0_i32, %c0_i32_0 : i32, i32, i32, i32
  }
  func.func @transform_1(%arg0: i32, %arg1: i32) -> (i32, i32, i32, i32) {
    %c0_i32 = arith.constant 0 : i32
    %c0_i32_0 = arith.constant 0 : i32
    %c0_i32_1 = arith.constant 0 : i32
    return %arg0, %arg1, %c0_i32, %c0_i32_0 : i32, i32, i32, i32
  }
  func.func @transform_2(%arg0: i32, %arg1: i32) -> (i32, i32) {
    %c0_i32 = arith.constant 0 : i32
    %c0_i32_0 = arith.constant 0 : i32
    %c0_i32_1 = arith.constant 0 : i32
    return %c0_i32, %c0_i32_0 : i32, i32
  }
  func.func @transform_3(%arg0: i32, %arg1: i32) -> (i32, i32) {
    %c0_i32 = arith.constant 0 : i32
    %c0_i32_0 = arith.constant 0 : i32
    %c0_i32_1 = arith.constant 0 : i32
    return %c0_i32, %c0_i32_0 : i32, i32
  }
  func.func @transform_4(%arg0: i32, %arg1: i32) -> i32 {
    %c0_i32 = arith.constant 0 : i32
    %c0_i32_0 = arith.constant 0 : i32
    return %c0_i32 : i32
  }
  func.func @transform_5(%arg0: i32, %arg1: i32) -> (i32, i32) {
    %c0_i32 = arith.constant 0 : i32
    %c0_i32_0 = arith.constant 0 : i32
    %c0_i32_1 = arith.constant 0 : i32
    return %c0_i32, %c0_i32_0 : i32, i32
  }
  func.func @transform_6(%arg0: i32, %arg1: i32) -> (i32, i32) {
    %c0_i32 = arith.constant 0 : i32
    %c0_i32_0 = arith.constant 0 : i32
    %c0_i32_1 = arith.constant 0 : i32
    return %c0_i32, %c0_i32_0 : i32, i32
  }
  func.func @transform_7(%arg0: i32, %arg1: i32) -> (i32, i32, i32) {
    %c0_i32 = arith.constant 0 : i32
    %c0_i32_0 = arith.constant 0 : i32
    return %arg0, %c0_i32, %arg1 : i32, i32, i32
  }
}

</mosaic_0001>

<bundles_post_ra>
// kernel: tpu_custom_call.1
= control target key start
LH: loop header
LB: loop body
LE: loop exit
PB: predicated region body
PF: predicated region fallthrough
CT: control target
= control target key end

     0   :  { %s4410_s0 = inlined_call_operand.vmem [shape: bf16[2,1,16,290], index: 0, kind: input, shape index: {}]   ;;  %s4411_s1 = inlined_call_operand.vmem [shape: f32[2,1,4,290], index: 1, kind: input, shape index: {}]   ;;  %s4412_s2 = inlined_call_operand.vmem [shape: bf16[256,144], index: 2, kind: input, shape index: {}]   ;;  %s4413_s3 = inlined_call_operand.vmem [shape: f32[256,1], index: 3, kind: input, shape index: {}]   ;;  %s4414_s4 = inlined_call_operand.<no memory space> [shape: f32[1], index: 4, kind: input, shape index: {}]   ;;  %s4415_s5 = inlined_call_operand.vmem [shape: f32[72,256], index: 5, kind: input, shape index: {}]   ;;  %s4416_s6 = inlined_call_operand.vmem [shape: f32[72,1], index: 6, kind: input, shape index: {}]   ;;  %s4417_s7 = inlined_call_operand.hbm [shape: f32[2,16,256], index: 7, kind: output, shape index: {}]  }
   0x1   :  { %12 = sst [smem:[#allocation3]] %s4414_s4 }
   0x2   :  { %13 = vsyncpa [#allocation5], 0 }
   0x3   :  { %15 = vsyncpa [#allocation5 + $0x1], 0  ;;  %s3061_s26 = smov 0   ;;  %s3063_s27 = smov 0  }
   0x4   :  { %s3065_s28 = smov 0   ;;  %s3067_s29 = smov 0  }
   0x5   :  { %s3069_s30 = smov 0   ;;  %s3071_s8 = smov 0  }
   0x6 LB: > { %s2607_s4 = sadd.s32 4294967295, %s3000_s8   ;;  %s2608_s9 = sadd.s32 4294967294, %s3000_s8   ;;  %s3000_s8 = sphi %s3071_s8, %s21_s8   ;;  %s2996_s30 = sphi %s3069_s30, %s4550_s30   ;;  %s2992_s29 = sphi %s3067_s29, %s4549_s29   ;;  %s2988_s28 = sphi %s3065_s28, %s4548_s28   ;;  %s2984_s27 = sphi %s3063_s27, %s4547_s27   ;;  %s2980_s26 = sphi %s3061_s26, %s4546_s26  }
   0x7   : > { %s33_s10 = sadd.s32 1, %s2996_s30  ;;  %s203_s11 = sadd.s32 1, %s2988_s28 }
   0x8   : > { %p35_p0 = scmp.ge.s32.totalorder %s33_s10, 2  ;;  %p213_p1 = scmp.ne.s32.totalorder %s2988_s28, %s2984_s27 }
   0x9   : > { %p214_p2 = scmp.eq.s32.totalorder %s2607_s4, 1  ;;  %p219_p3 = scmp.ne.s32.totalorder %s2984_s27, %s2980_s26 }
   0xa   : > { %s4552_s10 = smov (%p35_p0, %s33_s10), 0  ;;  %p220_p5 = scmp.eq.s32.totalorder %s2608_s9, 1 }
   0xb   : > { %p3101_p4 = por %p214_p2, %p213_p1  ;;  %s198_s13 = ssub.s32 %s2996_s30, %s4552_s10 }
   0xc   : > { %p2611_p6 = scmp.ge.s32.totalorder %s3000_s8, 1  ;;  %p201_p7 = scmp.eq.s32.totalorder %s198_s13, 0 }
   0xd   : > { %p3108_p8 = por %p220_p5, %p219_p3  ;;  %p277_p9 = scmp.lt.s32.totalorder %s3000_s8, 3 }
   0xe   : > { %s3114_s15 = scalar_select %p201_p7, %s2988_s28, %s203_s11  }
   0xf   : > { %p278_p10 = pnand %p2611_p6, %p277_p9 }
  0x11   : > { %281 = sbr.rel (%p278_p10) target bundleno = 1000 (0x3e8), region = 48 }
  0x18   : > { %v350_v0 = vlaneseq  ;;  %p322_p11 = scmp.lt.s32.totalorder %s2992_s29, 1  ;;  %v3002_v1 = vmov 0   ;;  %s3003_s25 = smov 18   ;;  %vm397_vm7 = vcmask 15360   ;;  %vm409_vm8 = vcmask 130048   ;;  %v666_v39 = vld [vmem:[%s4413_s3 + $0x40] sm:$0xff] }
  0x19   : > { %2825 = vset.pattern.permute.xlu1 %v3002_v1  ;;  %2826 = vset.pattern.permute.xlu0 %v3002_v1  ;;  %s3004_s4 = smov 2   ;;  %s3005_s9 = smov 32   ;;  %vm479_vm13 = vcmask 1039360   ;;  %vm420_vm14 = vcmask 146432   ;;  %v669_v41 = vld [vmem:[%s4413_s3 + $0x58] sm:$0xff] }
  0x1a   : > { %v351_v2 = vand.u32 127, %v350_v0  ;;  %s323_s16 = scalar_select %p322_p11, %s2992_s29, 1 }
  0x1b   : > { %s4418_s11 = smov 16   ;;  %s3007_s13 = smov 34  }
  0x1c   : > { %v352_v3 = vadd.s32 128, %v351_v2  ;;  %v357_v4 = vand.u32 15, %v351_v2  ;;  %s2754_s17 = smul.u32 12, %s323_s16  ;;  %s4421_s19 = smov 96  }
  0x1d   : > { %s2753_s18 = smul.u32 24, %s323_s16  ;;  %s3008_s16 = smov 127  }
  0x1e   : > { %v364_v5 = vand.u32 15, %v352_v3  ;;  %vm3119_vm0 = vcmp.ne.s32.totalorder %v357_v4, 15  ;;  %vm3123_vm1 = vcmp.ne.s32.totalorder %v357_v4, 0  ;;  %s3130_s21 = scalar_lea.vmem %s4411_s1, %s2754_s17  ;;  %s4423_s17 = smov 111  }
  0x1f   : > { %v3141_v10 = vld [vmem:[%s3130_s21] sm:$0xff]  ;;  %s330_s24 = scalar_lea.vmem %s4410_s0, %s2753_s18  ;;  %s3010_s18 = smov 126  }
  0x20   : > { %vm3132_vm2 = vcmp.ne.s32.totalorder %v364_v5, 15  ;;  %vm3136_vm3 = vcmp.ne.s32.totalorder %v364_v5, 0  ;;  %v3152_v11 = vcombine.high %v3141_v10, %v3141_v10  ;;  %v1624_v12 = vsel %vm3123_vm1, %v3141_v10, 0.0  ;;  %v3165_v15 = vld [vmem:[%s330_s24] sm:$0xff]  ;;  %v3167_v16 = vld [vmem:[%s330_s24 + $0xc] sm:$0xff]  ;;  %s3012_s20 = smov 112  }
  0x21   : > { %vm392_vm4 = vmpackc.low %vm3132_vm2, %vm3119_vm0  ;;  %1626 = vst [vmem:[#allocation2] sm:$0xf] %v1624_v12  ;;  %v3177_v19 = vcombine.high %v3165_v15, %v3167_v16  ;;  %v3179_v20 = vld [vmem:[%s330_s24 + $0x8] sm:$0xf]  ;;  %v3181_v21 = vld [vmem:[%s330_s24 + $0x14] sm:$0xf]  ;;  %v3191_v23 = vcombine.low %v3165_v15, %v3167_v16 }
  0x22   : > { %v393_v13 = vsel %vm392_vm4, 65537, %v3002_v1  ;;  %vm3161_vm5 = vmpackc.low %vm3136_vm3, %vm3123_vm1  ;;  %v1625_v17 = vsel %vm3136_vm3, %v3152_v11, 0.0  ;;  %v3187_v22 = vcombine.low %v3179_v20, %v3181_v21  ;;  %s4427_s22 = smov 110   ;;  %s4419_s23 = smov 95  }
  0x23   : > { %417 = vrot.lane.b32.xlu1 %v393_v13, %s3003_s25  ;;  %394 = vrot.lane.b32.xlu0 %v393_v13, %s3004_s4  ;;  %v405_v18 = vsel %vm3161_vm5, 65537, %v3002_v1  ;;  %1627 = vst [vmem:[#allocation2 + $0x8] sm:$0xf] %v1625_v17  ;;  %v386_v24 = vsel %vm3161_vm5, %v3165_v15, 0  ;;  %v387_v25 = vsel %vm3161_vm5, %v3167_v16, 0  ;;  %vm431_vm5 = vcmask 261120  }
  0x24   : > { %v2616_v26 = vcombine.high %v386_v24, %v387_v25  ;;  %v2615_v27 = vcombine.low %v386_v24, %v387_v25  ;;  %s4425_s4 = smov 94  }
  0x26   : > { %1043 = vmatprep.subr.bf16.mxu0 %v2616_v26 }
  0x27   : > { %428 = vrot.lane.b32.xlu1 %v405_v18, %s3005_s9  ;;  %406 = vrot.lane.b32.xlu0 %v405_v18, %s4418_s11 }
  0x28   : > { %1044 = vmatpush1.bf16.msra.mxu0 %v2615_v27 }
  0x2b   : > { %439 = vrot.lane.b32.xlu0 %v393_v13, %s3007_s13  ;;  %475 = vrot.lane.b32.xlu1 %v3177_v19, %s3008_s16 }
  0x2f   : > { %477 = vrot.lane.b32.xlu0 %v3187_v22, %s3008_s16  ;;  %473 = vrot.lane.b32.xlu1 %v3191_v23, %s3008_s16 }
  0x33   : > { %534 = vrot.lane.b32.xlu0 %v3177_v19, %s4423_s17  ;;  %536 = vrot.lane.b32.xlu1 %v3187_v22, %s4423_s17 }
  0x37   : > { %532 = vrot.lane.b32.xlu0 %v3191_v23, %s4423_s17 }
  0x95   : > { %v418_v28 = vpop.permute.xlu1 %417  ;;  %v395_v29 = vpop.permute.xlu0 %394 }
  0x96   : > { %v396_v30 = vrot.slane %v395_v29, 4  ;;  %v419_v46 = vrot.slane %v418_v28, 4 }
  0x98   : > { %vm400_vm6 = vcmp.ne.s16.totalorder %v396_v30, 0  ;;  %v398_v37 = vsel %vm397_vm7, %v396_v30, %v395_v29  ;;  %v421_v58 = vsel %vm420_vm14, %v419_v46, %v418_v28  ;;  %vm423_vm4 = vcmp.ne.s16.totalorder %v419_v46, 0  ;;  %v2833_v29 = vld [vmem:[%s4412_s2 + $0x4] ss:$8 sps:$4 sm:$0xff]  }
  0x99   : > { %v429_v31 = vpop.permute.xlu1 %428  ;;  %v407_v32 = vpop.permute.xlu0 %406  ;;  %v402_v33 = vsel %vm400_vm6, %v3179_v20, 0  ;;  %v404_v34 = vsel %vm400_vm6, %v3181_v21, 0  ;;  %vm399_vm12 = vcmp.ne.s16.totalorder %v398_v37, 0  ;;  %vm422_vm15 = vcmp.ne.s16.totalorder %v421_v58, 0  ;;  %2667 = vmatprep.mubr.msk.bf16.mxu0 %vm409_vm8, %v2833_v29  ;;  %v670_v46 = vld [vmem:[%s4413_s3 + $0x60] sm:$0xff] }
  0x9a   : > { %v430_v35 = vrot.slane %v429_v31, 4  ;;  %v408_v36 = vrot.slane %v407_v32, 4  ;;  %v2622_v38 = vcombine.low %v402_v33, %v404_v34  ;;  %v401_v55 = vsel %vm399_vm12, %v3165_v15, 0  ;;  %v663_v33 = vld [vmem:[%s4413_s3 + $0x28] sm:$0xff]  ;;  %v662_v34 = vld [vmem:[%s4413_s3 + $0x20] sm:$0xff] }
  0x9b   : > { %v403_v56 = vsel %vm399_vm12, %v3167_v16, 0  ;;  %v424_v63 = vsel %vm422_vm15, %v3165_v15, 0  ;;  %v426_v1 = vsel %vm422_vm15, %v3167_v16, 0  ;;  %v425_v3 = vsel %vm423_vm4, %v3179_v20, 0  ;;  %v682_v29 = vld [vmem:[%s4413_s3 + $0xc0] sm:$0xff] }
  0x9c   : > { %vm3211_vm9 = vcmp.ne.s16.totalorder %v430_v35, 0  ;;  %v410_v40 = vsel %vm409_vm8, %v408_v36, %v407_v32  ;;  %vm3216_vm10 = vcmp.ne.s16.totalorder %v408_v36, 0  ;;  %501 = vrot.lane.b32.xlu1 %v2622_v38, %s3010_s18  ;;  %v2621_v61 = vcombine.high %v401_v55, %v403_v56  ;;  %v661_v32 = vld [vmem:[%s4413_s3 + $0x18] sm:$0xff]  ;;  %v664_v36 = vld [vmem:[%s4413_s3 + $0x30] sm:$0xff]  ;;  %v667_v38 = vld [vmem:[%s4413_s3 + $0x48] sm:$0xff] }
  0x9d   : > { %v440_v42 = vpop.permute.xlu0 %439  ;;  %v476_v43 = vpop.permute.xlu1 %475  ;;  %v436_v44 = vsel %vm3211_vm9, %v3179_v20, 0  ;;  %v438_v45 = vsel %vm3211_vm9, %v3181_v21, 0  ;;  %vm411_vm11 = vcmp.ne.s16.totalorder %v410_v40, 0  ;;  %v414_v47 = vsel %vm3216_vm10, %v3179_v20, 0 }
  0x9e   : > { %v416_v48 = vsel %vm3216_vm10, %v3181_v21, 0  ;;  %v2631_v49 = vcombine.low %v436_v44, %v438_v45  ;;  %v413_v50 = vsel %vm411_vm11, %v3165_v15, 0  ;;  %v415_v51 = vsel %vm411_vm11, %v3167_v16, 0  ;;  %v671_v45 = vld [vmem:[%s4413_s3 + $0x68] sm:$0xff] }
  0x9f   : > { %v2625_v52 = vcombine.low %v414_v47, %v416_v48  ;;  %v2624_v60 = vcombine.high %v413_v50, %v415_v51  ;;  %v2623_v62 = vcombine.low %v413_v50, %v415_v51  ;;  %v2620_v2 = vcombine.low %v401_v55, %v403_v56  ;;  %v673_v48 = vld [vmem:[%s4413_s3 + $0x78] sm:$0xff]  ;;  %v674_v55 = vld [vmem:[%s4413_s3 + $0x80] sm:$0xff] }
  0xa0   : > { %584 = vrot.lane.b32.xlu1 %v2631_v49, %s4421_s19  ;;  %v427_v4 = vsel %vm423_vm4, %v3181_v21, 0  ;;  %v432_v5 = vsel %vm431_vm5, %v430_v35, %v429_v31  ;;  %v2627_v12 = vcombine.high %v424_v63, %v426_v1  ;;  %v2626_v14 = vcombine.low %v424_v63, %v426_v1  ;;  %v665_v35 = vld [vmem:[%s4413_s3 + $0x38] sm:$0xff]  ;;  %v672_v49 = vld [vmem:[%s4413_s3 + $0x70] sm:$0xff] }
  0xa1   : > { %v478_v53 = vpop.permute.xlu0 %477  ;;  %v474_v54 = vpop.permute.xlu1 %473  ;;  %525 = vrot.lane.b32.xlu0 %v2625_v52, %s3012_s20  ;;  %v2628_v13 = vcombine.low %v425_v3, %v427_v4  ;;  %vm433_vm6 = vcmp.ne.s16.totalorder %v432_v5, 0  ;;  %v441_v17 = vrot.slane %v440_v42, 4  ;;  %vm442_vm7 = vcmask 277504   ;;  %v678_v3 = vld [vmem:[%s4413_s3 + $0xa0] sm:$0xff] }
  0xa2   : > { %v481_v57 = vsel %vm479_vm13, %v476_v43, %v478_v53  ;;  %v480_v59 = vsel %vm479_vm13, %v474_v54, %v476_v43  ;;  %v435_v18 = vsel %vm433_vm6, %v3165_v15, 0  ;;  %v437_v24 = vsel %vm433_vm6, %v3167_v16, 0  ;;  %v675_v54 = vld [vmem:[%s4413_s3 + $0x88] sm:$0xff] }
  0xa3   : > { %1045 = vmatprep.subr.bf16.mxu0 %v481_v57  ;;  %v443_v25 = vsel %vm442_vm7, %v441_v17, %v440_v42  ;;  %vm445_vm9 = vcmp.ne.s16.totalorder %v441_v17, 0  ;;  %v2630_v26 = vcombine.high %v435_v18, %v437_v24  ;;  %v2629_v30 = vcombine.low %v435_v18, %v437_v24  ;;  %v668_v42 = vld [vmem:[%s4413_s3 + $0x50] sm:$0xff]  ;;  %v677_v57 = vld [vmem:[%s4413_s3 + $0x98] sm:$0xff] }
  0xa4   : > { %1046 = vmatpush1.bf16.msra.mxu0 %v480_v59  ;;  %523 = vrot.lane.b32.xlu1 %v2624_v60, %s3012_s20  ;;  %vm444_vm10 = vcmp.ne.s16.totalorder %v443_v25, 0  ;;  %v447_v27 = vsel %vm445_vm9, %v3179_v20, 0  ;;  %v449_v28 = vsel %vm445_vm9, %v3181_v21, 0  ;;  %vm503_vm11 = vcmask 1031168   ;;  %v676_v59 = vld [vmem:[%s4413_s3 + $0x90] sm:$0xff] }
  0xa5   : > { %499 = vrot.lane.b32.xlu0 %v2621_v61, %s3010_s18  ;;  %v448_v31 = vsel %vm444_vm10, %v3167_v16, 0  ;;  %v660_v16 = vld [vmem:[%s4413_s3 + $0x10] sm:$0xff]  ;;  %v537_v37 = vpop.permute.xlu1 %536  ;;  %v535_v40 = vpop.permute.xlu0 %534  ;;  %vm527_vm12 = vcmask 916480   ;;  %vm538_vm14 = vcmask 908288   ;;  %vm562_vm15 = vcmask 900096  }
  0xa6   : > { %v540_v4 = vsel %vm538_vm14, %v535_v40, %v537_v37  ;;  %vm586_vm4 = vcmask 785408   ;;  %vm597_vm5 = vcmask 777216   ;;  %vm4429_vm6 = vcmask 769024   ;;  %v688_v37 = vld [vmem:[%s4413_s3 + $0xf0] sm:$0xff] }
  0xa8   : > { %521 = vrot.lane.b32.xlu1 %v2623_v62, %s3012_s20 }
  0xa9   : > { %497 = vrot.lane.b32.xlu0 %v2620_v2, %s3010_s18  ;;  %v533_v44 = vpop.permute.xlu0 %532  ;;  %v679_v2 = vld [vmem:[%s4413_s3 + $0xa8] sm:$0xff] }
  0xaa   : > { %v539_v17 = vsel %vm538_vm14, %v533_v44, %v535_v40  ;;  %v2834_v40 = vld [vmem:[%s4412_s2 + $0x14] ss:$8 sps:$4 sm:$0xff]  }
  0xab   : > { %v1450_v44 = vld [vmem:[%s4416_s6 + $0x10] sm:$0xff] }
  0xac   : > { %558 = vrot.lane.b32.xlu1 %v2627_v12, %s4427_s22  ;;  %v681_v12 = vld [vmem:[%s4413_s3 + $0xb8] sm:$0xff] }
  0xad   : > { %560 = vrot.lane.b32.xlu0 %v2628_v13, %s4427_s22 }
  0xb0   : > { %556 = vrot.lane.b32.xlu1 %v2626_v14, %s4427_s22  ;;  %v680_v14 = vld [vmem:[%s4413_s3 + $0xb0] sm:$0xff] }
  0xb1   : > { %595 = vrot.lane.b32.xlu0 %v3187_v22, %s4419_s23  ;;  %v446_v22 = vsel %vm444_vm10, %v3165_v15, 0  ;;  %v658_v15 = vld [vmem:[%s4413_s3] sm:$0xff] }
  0xb2   : > { %v2633_v20 = vcombine.high %v446_v22, %v448_v31  ;;  %v2632_v21 = vcombine.low %v446_v22, %v448_v31  ;;  %v685_v22 = vld [vmem:[%s4413_s3 + $0xd8] sm:$0xff] }
  0xb4   : > { %593 = vrot.lane.b32.xlu1 %v3177_v19, %s4419_s23  ;;  %v2634_v19 = vcombine.low %v447_v27, %v449_v28  ;;  %v683_v28 = vld [vmem:[%s4413_s3 + $0xc8] sm:$0xff] }
  0xb5   : > { %582 = vrot.lane.b32.xlu0 %v2630_v26, %s4421_s19 }
  0xb8   : > { %591 = vrot.lane.b32.xlu1 %v3191_v23, %s4419_s23  ;;  %v659_v23 = vld [vmem:[%s4413_s3 + $0x8] sm:$0xff]  ;;  %s1236_s23 = sld [smem:[#allocation3]] }
  0xb9   : > { %580 = vrot.lane.b32.xlu0 %v2629_v30, %s4421_s19  ;;  %s4456_s19 = smov 110  }
  0xbc   : > { %619 = vrot.lane.b32.xlu1 %v2634_v19, %s4425_s4  ;;  %v684_v19 = vld [vmem:[%s4413_s3 + $0xd0] sm:$0xff] }
  0xbd   : > { %617 = vrot.lane.b32.xlu0 %v2633_v20, %s4425_s4 }
  0xc0   : > { %692 = vperm.xlu1 %2825, %v658_v15  }
  0xc1   : > { %615 = vrot.lane.b32.xlu0 %v2632_v21, %s4425_s4  ;;  %s3016_s4 = smov [#allocation4]  }
  0xc2   : > { %s2926_s9 = sshll.u32 %s3016_s4, 4  ;;  %s2927_s9 = int_to_ptr.vmem [resolvable:$false] %s2926_s9 }
  0xc3   : > { %s2928_s13 = scalar_lea.vmem %s2927_s9, 1024 }
  0xc4   : > { %702 = vperm.xlu1 %2825, %v660_v16  }
  0xc5   : > { %697 = vperm.xlu0 %2826, %v659_v23  }
  0xc8   : > { %707 = vperm.xlu1 %2825, %v661_v32  }
  0xc9   : > { %712 = vperm.xlu0 %2826, %v662_v34   ;;  %v686_v34 = vld [vmem:[%s4413_s3 + $0xe0] sm:$0xff] }
  0xcc   : > { %717 = vperm.xlu1 %2825, %v663_v33   ;;  %v687_v33 = vld [vmem:[%s4413_s3 + $0xe8] sm:$0xff] }
  0xcd   : > { %722 = vperm.xlu0 %2826, %v664_v36  }
  0xd0   : > { %727 = vperm.xlu1 %2825, %v665_v35   ;;  %v689_v35 = vld [vmem:[%s4413_s3 + $0xf8] sm:$0xff] }
  0xd1   : > { %732 = vperm.xlu0 %2826, %v666_v39   ;;  %v2831_v39 = vld [vmem:[%s4412_s2] ss:$8 sps:$4 sm:$0xff]  }
  0xd4   : > { %737 = vperm.xlu1 %2825, %v667_v38  }
  0xd5   : > { %742 = vperm.xlu0 %2826, %v668_v42   ;;  %v1448_v42 = vld [vmem:[%s4416_s6] sm:$0xff] }
  0xd8   : > { %747 = vperm.xlu1 %2825, %v669_v41   ;;  %v1449_v41 = vld [vmem:[%s4416_s6 + $0x8] sm:$0xff] }
  0xd9   : > { %752 = vperm.xlu0 %2826, %v670_v46   ;;  %v2837_v46 = vld [vmem:[%s4412_s2 + $0x24] ss:$8 sps:$4 sm:$0xff]  }
  0xdc   : > { %757 = vperm.xlu1 %2825, %v671_v45   ;;  %v2836_v45 = vld [vmem:[%s4412_s2 + $0x10] ss:$8 sps:$4 sm:$0xff]  }
  0xdd   : > { %762 = vperm.xlu0 %2826, %v672_v49   ;;  %v1455_v49 = vld [vmem:[%s4416_s6 + $0x38] sm:$0xff] }
  0xe0   : > { %767 = vperm.xlu1 %2825, %v673_v48   ;;  %v1452_v48 = vld [vmem:[%s4416_s6 + $0x20] sm:$0xff] }
  0xe1   : > { %772 = vperm.xlu0 %2826, %v674_v55   ;;  %v2843_v55 = vld [vmem:[%s4412_s2 + $0x44] ss:$8 sps:$4 sm:$0xff]  }
  0xe4   : > { %777 = vperm.xlu1 %2825, %v675_v54   ;;  %v2842_v54 = vld [vmem:[%s4412_s2 + $0x30] ss:$8 sps:$4 sm:$0xff]  }
  0xe5   : > { %782 = vperm.xlu0 %2826, %v676_v59   ;;  %v2849_v59 = vld [vmem:[%s4412_s2 + $0x64] ss:$8 sps:$4 sm:$0xff]  }
  0xe8   : > { %787 = vperm.xlu1 %2825, %v677_v57   ;;  %v2846_v57 = vld [vmem:[%s4412_s2 + $0x54] ss:$8 sps:$4 sm:$0xff]  }
  0xe9   : > { %792 = vperm.xlu0 %2826, %v678_v3   ;;  %v2860_v3 = vld [vmem:[%s4412_s2 + $0x90] ss:$8 sps:$4 sm:$0xff]  }
  0xec   : > { %797 = vperm.xlu1 %2825, %v679_v2   ;;  %v2858_v2 = vld [vmem:[%s4412_s2 + $0x94] ss:$8 sps:$4 sm:$0xff]  }
  0xed   : > { %802 = vperm.xlu0 %2826, %v680_v14   ;;  %v2867_v14 = vld [vmem:[%s4412_s2 + $0xc4] ss:$8 sps:$4 sm:$0xff]  }
  0xf0   : > { %807 = vperm.xlu1 %2825, %v681_v12   ;;  %v2864_v12 = vld [vmem:[%s4412_s2 + $0xb4] ss:$8 sps:$4 sm:$0xff]  }
  0xf1   : > { %812 = vperm.xlu0 %2826, %v682_v29  }
  0xf4   : > { %817 = vperm.xlu1 %2825, %v683_v28   ;;  %v2878_v28 = vld [vmem:[%s4412_s2 + $0xf0] ss:$8 sps:$4 sm:$0xff]  }
  0xf5   : > { %822 = vperm.xlu0 %2826, %v684_v19  }
  0xf8   : > { %827 = vperm.xlu1 %2825, %v685_v22   ;;  %v3522_v22 = vstv %s1236_s23  ;;  %s319_s23 = sand.u32 1, %s2984_s27  }
  0xf9   : > { %832 = vperm.xlu0 %2826, %v686_v34   ;;  %s2612_s25 = sshll.u32 %s319_s23, 5 }
  0xfa   : > { %s321_s17 = scalar_lea.vmem [#allocation4], %s2612_s25 }
  0xfc   : > { %837 = vperm.xlu1 %2825, %v687_v33  }
  0xfd   : > { %842 = vperm.xlu0 %2826, %v688_v37  }
 0x100   : > { %847 = vperm.xlu1 %2825, %v689_v35  }
 0x101   : > { %1459 = vperm.xlu0 %2826, %v1448_v42  }
 0x104   : > { %1464 = vperm.xlu1 %2825, %v1449_v41  }
 0x105   : > { %1469 = vperm.xlu0 %2826, %v1450_v44  }
 0x109   : > { %1479 = vperm.xlu0 %2826, %v1452_v48  }
 0x10e   : > { %v502_v43 = vpop.permute.xlu1 %501 }
 0x112   : > { %v585_v47 = vpop.permute.xlu1 %584 }
 0x113   : > { %v526_v50 = vpop.permute.xlu0 %525 }
 0x116   : > { %v524_v51 = vpop.permute.xlu1 %523 }
 0x117   : > { %v500_v52 = vpop.permute.xlu0 %499  ;;  %v529_v61 = vsel %vm527_vm12, %v524_v51, %v526_v50  ;;  %v1454_v50 = vld [vmem:[%s4416_s6 + $0x30] sm:$0xff] }
 0x118   : > { %v505_v53 = vsel %vm503_vm11, %v500_v52, %v502_v43  ;;  %v1451_v43 = vld [vmem:[%s4416_s6 + $0x18] sm:$0xff]  ;;  %1489 = vperm.xlu0 %2826, %v1454_v50  }
 0x119   : > { %1047 = vmatprep.subr.bf16.mxu0 %v505_v53  ;;  %1474 = vperm.xlu1 %2825, %v1451_v43   ;;  %v1456_v53 = vld [vmem:[%s4416_s6 + $0x40] sm:$0xff] }
 0x11a   : > { %v522_v56 = vpop.permute.xlu1 %521 }
 0x11b   : > { %v498_v58 = vpop.permute.xlu0 %497  ;;  %v528_v1 = vsel %vm527_vm12, %v522_v56, %v524_v51  ;;  %v2839_v51 = vld [vmem:[%s4412_s2 + $0x20] ss:$8 sps:$4 sm:$0xff]  }
 0x11c   : > { %v504_v60 = vsel %vm503_vm11, %v498_v58, %v500_v52  ;;  %v2840_v52 = vld [vmem:[%s4412_s2 + $0x34] ss:$8 sps:$4 sm:$0xff]   ;;  %1499 = vperm.xlu0 %2826, %v1456_v53   ;;  %v2845_v56 = vld [vmem:[%s4412_s2 + $0x40] ss:$8 sps:$4 sm:$0xff]   ;;  %v2848_v58 = vld [vmem:[%s4412_s2 + $0x50] ss:$8 sps:$4 sm:$0xff]  }
 0x11d   : > { %1048 = vmatpush1.bf16.msra.mxu0 %v504_v60  ;;  %v2851_v60 = vld [vmem:[%s4412_s2 + $0x60] ss:$8 sps:$4 sm:$0xff]  }
 0x11e   : > { %1049 = vmatprep.subr.bf16.mxu0 %v529_v61  ;;  %v559_v62 = vpop.permute.xlu1 %558  ;;  %v2852_v61 = vld [vmem:[%s4412_s2 + $0x74] ss:$8 sps:$4 sm:$0xff]  }
 0x11f   : > { %v561_v63 = vpop.permute.xlu0 %560 }
 0x120   : > { %v564_v18 = vsel %vm562_vm15, %v559_v62, %v561_v63  ;;  %1633 = vrot.lane.b32.xlu0 %v3141_v10, %s3008_s16  ;;  %v2855_v63 = vld [vmem:[%s4412_s2 + $0x84] ss:$8 sps:$4 sm:$0xff]  }
 0x121   : > { %1050 = vmatpush1.bf16.msra.mxu0 %v528_v1  ;;  %v2857_v1 = vld [vmem:[%s4412_s2 + $0x80] ss:$8 sps:$4 sm:$0xff]  }
 0x122   : > { %1051 = vmatprep.subr.bf16.mxu0 %v540_v4  ;;  %v557_v5 = vpop.permute.xlu1 %556  ;;  %v2861_v4 = vld [vmem:[%s4412_s2 + $0xa4] ss:$8 sps:$4 sm:$0xff]  }
 0x123   : > { %v596_v13 = vpop.permute.xlu0 %595  ;;  %v563_v26 = vsel %vm562_vm15, %v557_v5, %v559_v62  ;;  %v2854_v62 = vld [vmem:[%s4412_s2 + $0x70] ss:$8 sps:$4 sm:$0xff]   ;;  %v2863_v5 = vld [vmem:[%s4412_s2 + $0xa0] ss:$8 sps:$4 sm:$0xff]  }
 0x124   : > { %1644 = vrot.lane.b32.xlu0 %v3141_v10, %s3010_s18 }
 0x125   : > { %1052 = vmatpush1.bf16.msra.mxu0 %v539_v17  ;;  %v2869_v17 = vld [vmem:[%s4412_s2 + $0xc0] ss:$8 sps:$4 sm:$0xff]  }
 0x126   : > { %1053 = vmatprep.subr.bf16.mxu0 %v564_v18  ;;  %v594_v24 = vpop.permute.xlu1 %593  ;;  %v2870_v18 = vld [vmem:[%s4412_s2 + $0xd4] ss:$8 sps:$4 sm:$0xff]  }
 0x127   : > { %v583_v25 = vpop.permute.xlu0 %582  ;;  %v599_v21 = vsel %vm597_vm5, %v594_v24, %v596_v13  ;;  %v2866_v13 = vld [vmem:[%s4412_s2 + $0xb0] ss:$8 sps:$4 sm:$0xff]  }
 0x128   : > { %v588_v27 = vsel %vm586_vm4, %v583_v25, %v585_v47  ;;  %v1453_v47 = vld [vmem:[%s4416_s6 + $0x28] sm:$0xff] }
 0x129   : > { %1054 = vmatpush1.bf16.msra.mxu0 %v563_v26  ;;  %1484 = vperm.xlu1 %2825, %v1453_v47   ;;  %v2875_v26 = vld [vmem:[%s4412_s2 + $0xe0] ss:$8 sps:$4 sm:$0xff]  }
 0x12a   : > { %1055 = vmatprep.subr.bf16.mxu0 %v588_v27  ;;  %v592_v30 = vpop.permute.xlu1 %591  ;;  %v2876_v27 = vld [vmem:[%s4412_s2 + $0xf4] ss:$8 sps:$4 sm:$0xff]  }
 0x12b   : > { %v581_v31 = vpop.permute.xlu0 %580  ;;  %v598_v23 = vsel %vm597_vm5, %v592_v30, %v594_v24  ;;  %v2872_v24 = vld [vmem:[%s4412_s2 + $0xd0] ss:$8 sps:$4 sm:$0xff]  }
 0x12c   : > { %v587_v20 = vsel %vm586_vm4, %v581_v31, %v583_v25  ;;  %v2873_v25 = vld [vmem:[%s4412_s2 + $0xe4] ss:$8 sps:$4 sm:$0xff]  }
 0x12d   : > { %1056 = vmatpush1.bf16.msra.mxu0 %v587_v20  ;;  %1494 = vperm.xlu1 %2825, %v1455_v49  }
 0x12e   : > { %1057 = vmatprep.subr.bf16.mxu0 %v599_v21  ;;  %v620_v15 = vpop.permute.xlu1 %619 }
 0x12f   : > { %v618_v16 = vpop.permute.xlu0 %617 }
 0x130   : > { %v623_v32 = vsel %vm4429_vm6, %v618_v16, %v620_v15 }
 0x131   : > { %1058 = vmatpush1.bf16.msra.mxu0 %v598_v23 }
 0x132   : > { %1059 = vmatprep.subr.bf16.mxu0 %v623_v32 }
 0x133   : > { %v616_v36 = vpop.permute.xlu0 %615 }
 0x134   : > { %v622_v38 = vsel %vm4429_vm6, %v616_v36, %v618_v16  ;;  %v1431_v36 = vld [vmem:[%s4415_s5 + $0x8] sm:$0xff] }
 0x135   : > { %1060 = vmatpush1.bf16.msra.mxu0 %v622_v38  ;;  %1566 = vmatprep.mubr.f32.mxu1 %v1431_v36 }
 0x138   : > { %1076 = vmatmul.mubr.bf16.vlgmr.msra.gmra.mrb[0].mxu0 %v2831_v39 }
 0x139   : > { %2668 = vmatprep.mubr.msk.bf16.mxu0 %vm409_vm8, %v2834_v40 }
 0x13f   : > { %v693_v29 = vpop.permute.xlu1 %692 }
 0x140   : > { %1086 = vmatmul.mubr.bf16.gmra.mrb[4].mxu0 %v2836_v45 }
 0x141   : > { %2669 = vmatprep.mubr.msk.bf16.mxu0 %vm409_vm8, %v2837_v46 }
 0x143   : > { %v703_v33 = vpop.permute.xlu1 %702 }
 0x144   : > { %v698_v20 = vpop.permute.xlu0 %697 }
 0x147   : > { %v708_v48 = vpop.permute.xlu1 %707 }
 0x148   : > { %1096 = vmatmul.mubr.bf16.gmra.mrb[8].mxu0 %v2839_v51 }
 0x149   : > { %2670 = vmatprep.mubr.msk.bf16.mxu0 %vm409_vm8, %v2840_v52 }
 0x150   : > { %1106 = vmatmul.mubr.bf16.gmra.mrb[12].mxu0 %v2842_v54 }
 0x151   : > { %2671 = vmatprep.mubr.msk.bf16.mxu0 %vm409_vm8, %v2843_v55 }
 0x158   : > { %1116 = vmatmul.mubr.bf16.gmra.mrb[16].mxu0 %v2845_v56 }
 0x159   : > { %2672 = vmatprep.mubr.msk.bf16.mxu0 %vm409_vm8, %v2846_v57 }
 0x160   : > { %1126 = vmatmul.mubr.bf16.gmra.mrb[20].mxu0 %v2848_v58 }
 0x161   : > { %2673 = vmatprep.mubr.msk.bf16.mxu0 %vm409_vm8, %v2849_v59 }
 0x168   : > { %1136 = vmatmul.mubr.bf16.gmra.mrb[24].mxu0 %v2851_v60  ;;  %v713_v60 = vpop.permute.xlu0 %712 }
 0x169   : > { %2674 = vmatprep.mubr.msk.bf16.mxu0 %vm409_vm8, %v2852_v61 }
 0x170   : > { %1146 = vmatmul.mubr.bf16.gmra.mrb[28].mxu0 %v2854_v62 }
 0x171   : > { %2675 = vmatprep.mubr.msk.bf16.mxu0 %vm409_vm8, %v2855_v63 }
 0x178   : > { %1156 = vmatmul.mubr.bf16.gmra.mrb[32].mxu0 %v2857_v1 }
 0x179   : > { %2676 = vmatprep.mubr.msk.bf16.mxu0 %vm409_vm8, %v2858_v2 }
 0x180   : > { %1166 = vmatmul.mubr.bf16.gmra.mrb[36].mxu0 %v2860_v3 }
 0x181   : > { %2677 = vmatprep.mubr.msk.bf16.mxu0 %vm409_vm8, %v2861_v4 }
 0x188   : > { %1176 = vmatmul.mubr.bf16.gmra.mrb[40].mxu0 %v2863_v5  ;;  %v718_v5 = vpop.permute.xlu1 %717 }
 0x189   : > { %2678 = vmatprep.mubr.msk.bf16.mxu0 %vm409_vm8, %v2864_v12 }
 0x190   : > { %1186 = vmatmul.mubr.bf16.gmra.mrb[44].mxu0 %v2866_v13 }
 0x191   : > { %2679 = vmatprep.mubr.msk.bf16.mxu0 %vm409_vm8, %v2867_v14 }
 0x198   : > { %1196 = vmatmul.mubr.bf16.gmra.mrb[48].mxu0 %v2869_v17 }
 0x199   : > { %2680 = vmatprep.mubr.msk.bf16.mxu0 %vm409_vm8, %v2870_v18 }
 0x1a0   : > { %1206 = vmatmul.mubr.bf16.gmra.mrb[52].mxu0 %v2872_v24 }
 0x1a1   : > { %2681 = vmatprep.mubr.msk.bf16.mxu0 %vm409_vm8, %v2873_v25 }
 0x1a8   : > { %1216 = vmatmul.mubr.bf16.gmra.mrb[56].mxu0 %v2875_v26 }
 0x1a9   : > { %2682 = vmatprep.mubr.msk.bf16.mxu0 %vm409_vm8, %v2876_v27 }
 0x1b0   : > { %1226 = vmatmul.mubr.bf16.gmra.mrb[60].mxu0 %v2878_v28 }
 0x20b   : > { %v1077_v30 = vpop.f32.mrb[0].mxu0 }
 0x20c   : > { %v1078_v31 = vadd.f32 %v1077_v30, %v693_v29  ;;  %v1079_v19 = vpop.f32.mrb[1].mxu0  ;;  %v723_v30 = vpop.permute.xlu0 %722 }
 0x20d   : > { %v1080_v21 = vadd.f32 %v1079_v19, %v693_v29  ;;  %v1081_v15 = vpop.f32.mrb[2].mxu0 }
 0x20e   : > { %v1302_v16 = vmul.f32 %v3522_v22, %v1078_v31  ;;  %v1082_v23 = vadd.f32 %v1081_v15, %v698_v20  ;;  %v1083_v32 = vpop.f32.mrb[3].mxu0  ;;  %vm1237_vm8 = vcmp.ge.f32.partialorder %v1078_v31, 0.0 }
 0x20f   : > { %v1303_v34 = vmul.f32 %v3522_v22, %v1080_v21  ;;  %v1084_v35 = vadd.f32 %v1083_v32, %v698_v20  ;;  %vm1238_vm7 = vcmp.ge.f32.partialorder %v1080_v21, 0.0  ;;  %v728_v32 = vpop.permute.xlu1 %727 }
 0x210   : > { %v1304_v37 = vmul.f32 %v3522_v22, %v1082_v23  ;;  %vm1239_vm9 = vcmp.ge.f32.partialorder %v1082_v23, 0.0  ;;  %v1366_v39 = vsel %vm1237_vm8, %v1078_v31, %v1302_v16 }
 0x211   : > { %v1305_v38 = vmul.f32 %v3522_v22, %v1084_v35  ;;  %vm1240_vm10 = vcmp.ge.f32.partialorder %v1084_v35, 0.0  ;;  %v1367_v42 = vsel %vm1238_vm7, %v1080_v21, %v1303_v34 }
 0x212   : > { %v1368_v40 = vsel %vm1239_vm9, %v1082_v23, %v1304_v37 }
 0x213   : > { %v1087_v41 = vpop.f32.mrb[4].mxu0  ;;  %v1369_v43 = vsel %vm1240_vm10, %v1084_v35, %v1305_v38  ;;  %v2691_v44 = vpack.c.bf16 %v1368_v40, %v1366_v39 }
 0x214   : > { %v1088_v45 = vadd.f32 %v1087_v41, %v703_v33  ;;  %v1089_v46 = vpop.f32.mrb[5].mxu0  ;;  %v2689_v47 = vpack.c.bf16 %v1369_v43, %v1367_v42 }
 0x215   : > { %v1090_v49 = vadd.f32 %v1089_v46, %v703_v33  ;;  %v1091_v50 = vpop.f32.mrb[6].mxu0 }
 0x216   : > { %v1306_v51 = vmul.f32 %v3522_v22, %v1088_v45  ;;  %v1092_v52 = vadd.f32 %v1091_v50, %v708_v48  ;;  %v1093_v53 = vpop.f32.mrb[7].mxu0  ;;  %2690 = vmatprep.subr.bf16.mxu1 %v2689_v47  ;;  %vm1241_vm6 = vcmp.ge.f32.partialorder %v1088_v45, 0.0 }
 0x217   : > { %v1307_v54 = vmul.f32 %v3522_v22, %v1090_v49  ;;  %v1094_v55 = vadd.f32 %v1093_v53, %v708_v48  ;;  %2692 = vmatpush1.bf16.msra.mxu1 %v2691_v44  ;;  %vm1242_vm8 = vcmp.ge.f32.partialorder %v1090_v49, 0.0  ;;  %v733_v44 = vpop.permute.xlu0 %732 }
 0x218   : > { %vm1243_vm7 = vcmp.ge.f32.partialorder %v1092_v52, 0.0  ;;  %v1308_v56 = vmul.f32 %v3522_v22, %v1092_v52  ;;  %v1370_v58 = vsel %vm1241_vm6, %v1088_v45, %v1306_v51 }
 0x219   : > { %vm1244_vm9 = vcmp.ge.f32.partialorder %v1094_v55, 0.0  ;;  %v1309_v57 = vmul.f32 %v3522_v22, %v1094_v55  ;;  %v1371_v62 = vsel %vm1242_vm8, %v1090_v49, %v1307_v54 }
 0x21a   : > { %v1372_v59 = vsel %vm1243_vm7, %v1092_v52, %v1308_v56  ;;  %v738_v52 = vpop.permute.xlu1 %737 }
 0x21b   : > { %v1097_v61 = vpop.f32.mrb[8].mxu0  ;;  %v1373_v63 = vsel %vm1244_vm9, %v1094_v55, %v1309_v57  ;;  %v2695_v1 = vpack.c.bf16 %v1372_v59, %v1370_v58 }
 0x21c   : > { %v1098_v2 = vadd.f32 %v1097_v61, %v713_v60  ;;  %v1099_v3 = vpop.f32.mrb[9].mxu0  ;;  %v2693_v4 = vpack.c.bf16 %v1373_v63, %v1371_v62 }
 0x21d   : > { %v1100_v12 = vadd.f32 %v1099_v3, %v713_v60  ;;  %v1101_v13 = vpop.f32.mrb[10].mxu0  ;;  %v743_v3 = vpop.permute.xlu0 %742 }
 0x21e   : > { %v1310_v14 = vmul.f32 %v3522_v22, %v1098_v2  ;;  %v1102_v17 = vadd.f32 %v1101_v13, %v718_v5  ;;  %v1103_v18 = vpop.f32.mrb[11].mxu0  ;;  %2694 = vmatprep.subr.bf16.mxu1 %v2693_v4  ;;  %vm1245_vm10 = vcmp.ge.f32.partialorder %v1098_v2, 0.0 }
 0x21f   : > { %v1311_v24 = vmul.f32 %v3522_v22, %v1100_v12  ;;  %v1104_v25 = vadd.f32 %v1103_v18, %v718_v5  ;;  %2696 = vmatpush1.bf16.msra.mxu1 %v2695_v1  ;;  %vm1246_vm6 = vcmp.ge.f32.partialorder %v1100_v12, 0.0  ;;  %v3549_v1 = vcombine.low %v3141_v10, %v3141_v10 }
 0x220   : > { %vm1247_vm8 = vcmp.ge.f32.partialorder %v1102_v17, 0.0  ;;  %v1312_v26 = vmul.f32 %v3522_v22, %v1102_v17  ;;  %v1374_v28 = vsel %vm1245_vm10, %v1098_v2, %v1310_v14  ;;  %v3552_v2 = vld [vmem:[%s3130_s21 + $0x8] sm:$0xf] }
 0x221   : > { %vm1248_vm7 = vcmp.ge.f32.partialorder %v1104_v25, 0.0  ;;  %v1313_v27 = vmul.f32 %v3522_v22, %v1104_v25  ;;  %v1375_v19 = vsel %vm1246_vm6, %v1100_v12, %v1311_v24  ;;  %1648 = vrot.lane.b32.xlu0 %v3552_v2, %s3010_s18  ;;  %1631 = vrot.lane.b32.xlu1 %v3549_v1, %s3008_s16  ;;  %v3560_v10 = vcombine.low %v3552_v2, %v3552_v2  ;;  %v748_v24 = vpop.permute.xlu1 %747 }
 0x222   : > { %v1376_v29 = vsel %vm1247_vm8, %v1102_v17, %v1312_v26 }
 0x223   : > { %v1107_v31 = vpop.f32.mrb[12].mxu0  ;;  %v1377_v20 = vsel %vm1248_vm7, %v1104_v25, %v1313_v27  ;;  %v2699_v21 = vpack.c.bf16 %v1376_v29, %v1374_v28 }
 0x224   : > { %v1108_v15 = vadd.f32 %v1107_v31, %v723_v30  ;;  %v1109_v16 = vpop.f32.mrb[13].mxu0  ;;  %v2697_v23 = vpack.c.bf16 %v1377_v20, %v1375_v19 }
 0x225   : > { %v1110_v33 = vadd.f32 %v1109_v16, %v723_v30  ;;  %v1111_v34 = vpop.f32.mrb[14].mxu0  ;;  %1661 = vrot.lane.b32.xlu0 %v3152_v11, %s3012_s20  ;;  %1635 = vrot.lane.b32.xlu1 %v3560_v10, %s3008_s16  ;;  %v753_v16 = vpop.permute.xlu0 %752  ;;  %s4458_s16 = smov 96  }
 0x226   : > { %v1314_v35 = vmul.f32 %v3522_v22, %v1108_v15  ;;  %v1112_v36 = vadd.f32 %v1111_v34, %v728_v32  ;;  %v1113_v37 = vpop.f32.mrb[15].mxu0  ;;  %2698 = vmatprep.subr.bf16.mxu1 %v2697_v23  ;;  %vm1249_vm9 = vcmp.ge.f32.partialorder %v1108_v15, 0.0 }
 0x227   : > { %v1315_v38 = vmul.f32 %v3522_v22, %v1110_v33  ;;  %v1114_v39 = vadd.f32 %v1113_v37, %v728_v32  ;;  %2700 = vmatpush1.bf16.msra.mxu1 %v2699_v21  ;;  %vm1250_vm10 = vcmp.ge.f32.partialorder %v1110_v33, 0.0 }
 0x228   : > { %vm1251_vm6 = vcmp.ge.f32.partialorder %v1112_v36, 0.0  ;;  %v1316_v40 = vmul.f32 %v3522_v22, %v1112_v36  ;;  %v1378_v42 = vsel %vm1249_vm9, %v1108_v15, %v1314_v35  ;;  %v3571_v35 = vld [vmem:[%s3130_s21] sm:$0xff]  ;;  %s4457_s21 = smov 111  }
 0x229   : > { %vm1252_vm8 = vcmp.ge.f32.partialorder %v1114_v39, 0.0  ;;  %v1317_v41 = vmul.f32 %v3522_v22, %v1114_v39  ;;  %v1379_v46 = vsel %vm1250_vm10, %v1110_v33, %v1315_v38  ;;  %1693 = vrot.lane.b32.xlu0 %v3571_v35, %s4456_s19  ;;  %1646 = vrot.lane.b32.xlu1 %v3152_v11, %s3010_s18  ;;  %s4459_s18 = smov 95  }
 0x22a   : > { %v1380_v43 = vsel %vm1251_vm6, %v1112_v36, %v1316_v40 }
 0x22b   : > { %v1117_v45 = vpop.f32.mrb[16].mxu0  ;;  %v1381_v47 = vsel %vm1252_vm8, %v1114_v39, %v1317_v41  ;;  %v2703_v48 = vpack.c.bf16 %v1380_v43, %v1378_v42  ;;  %v758_v39 = vpop.permute.xlu1 %757 }
 0x22c   : > { %v1118_v49 = vadd.f32 %v1117_v45, %v733_v44  ;;  %v1119_v50 = vpop.f32.mrb[17].mxu0  ;;  %v2701_v51 = vpack.c.bf16 %v1381_v47, %v1379_v46 }
 0x22d   : > { %v1120_v53 = vadd.f32 %v1119_v50, %v733_v44  ;;  %v1121_v54 = vpop.f32.mrb[18].mxu0  ;;  %1697 = vrot.lane.b32.xlu0 %v3552_v2, %s4456_s19  ;;  %1659 = vrot.lane.b32.xlu1 %v3571_v35, %s3012_s20 }
 0x22e   : > { %v1318_v55 = vmul.f32 %v3522_v22, %v1118_v49  ;;  %v1122_v56 = vadd.f32 %v1121_v54, %v738_v52  ;;  %v1123_v57 = vpop.f32.mrb[19].mxu0  ;;  %2702 = vmatprep.subr.bf16.mxu1 %v2701_v51  ;;  %vm1253_vm7 = vcmp.ge.f32.partialorder %v1118_v49, 0.0  ;;  %v763_v51 = vpop.permute.xlu0 %762 }
 0x22f   : > { %v1319_v58 = vmul.f32 %v3522_v22, %v1120_v53  ;;  %v1124_v59 = vadd.f32 %v1123_v57, %v738_v52  ;;  %2704 = vmatpush1.bf16.msra.mxu1 %v2703_v48  ;;  %vm1254_vm9 = vcmp.ge.f32.partialorder %v1120_v53, 0.0 }
 0x230   : > { %vm1255_vm10 = vcmp.ge.f32.partialorder %v1122_v56, 0.0  ;;  %v1320_v60 = vmul.f32 %v3522_v22, %v1122_v56  ;;  %v1382_v62 = vsel %vm1253_vm7, %v1118_v49, %v1318_v55 }
 0x231   : > { %vm1256_vm6 = vcmp.ge.f32.partialorder %v1124_v59, 0.0  ;;  %v1321_v61 = vmul.f32 %v3522_v22, %v1124_v59  ;;  %v1383_v5 = vsel %vm1254_vm9, %v1120_v53, %v1319_v58  ;;  %1682 = vrot.lane.b32.xlu0 %v3152_v11, %s4457_s21  ;;  %1663 = vrot.lane.b32.xlu1 %v3552_v2, %s3012_s20  ;;  %s4460_s20 = smov 94  }
 0x232   : > { %v1384_v63 = vsel %vm1255_vm10, %v1122_v56, %v1320_v60 }
 0x233   : > { %v1127_v4 = vpop.f32.mrb[20].mxu0  ;;  %v1385_v12 = vsel %vm1256_vm6, %v1124_v59, %v1321_v61  ;;  %v2707_v13 = vpack.c.bf16 %v1384_v63, %v1382_v62  ;;  %v768_v59 = vpop.permute.xlu1 %767 }
 0x234   : > { %v1128_v14 = vadd.f32 %v1127_v4, %v743_v3  ;;  %v1129_v17 = vpop.f32.mrb[21].mxu0  ;;  %v2705_v18 = vpack.c.bf16 %v1385_v12, %v1383_v5 }
 0x235   : > { %v1130_v25 = vadd.f32 %v1129_v17, %v743_v3  ;;  %v1131_v26 = vpop.f32.mrb[22].mxu0  ;;  %1714 = vrot.lane.b32.xlu0 %v3571_v35, %s4458_s16  ;;  %1695 = vrot.lane.b32.xlu1 %v3152_v11, %s4456_s19  ;;  %s2688_s19 = sshll.u32 %s2992_s29, 9  ;;  %s4363_s29 = scalar_lea.sflag [#allocation5], %s319_s23 }
 0x236   : > { %v1322_v27 = vmul.f32 %v3522_v22, %v1128_v14  ;;  %v1132_v28 = vadd.f32 %v1131_v26, %v748_v24  ;;  %v1133_v29 = vpop.f32.mrb[23].mxu0  ;;  %2706 = vmatprep.subr.bf16.mxu1 %v2705_v18  ;;  %vm1257_vm8 = vcmp.ge.f32.partialorder %v1128_v14, 0.0  ;;  %v773_v18 = vpop.permute.xlu0 %772 }
 0x237   : > { %v1323_v30 = vmul.f32 %v3522_v22, %v1130_v25  ;;  %v1134_v31 = vadd.f32 %v1133_v29, %v748_v24  ;;  %2708 = vmatpush1.bf16.msra.mxu1 %v2707_v13  ;;  %vm1258_vm7 = vcmp.ge.f32.partialorder %v1130_v25, 0.0 }
 0x238   : > { %vm1259_vm9 = vcmp.ge.f32.partialorder %v1132_v28, 0.0  ;;  %v1324_v19 = vmul.f32 %v3522_v22, %v1132_v28  ;;  %v1386_v21 = vsel %vm1257_vm8, %v1128_v14, %v1322_v27 }
 0x239   : > { %vm1260_vm10 = vcmp.ge.f32.partialorder %v1134_v31, 0.0  ;;  %v1325_v20 = vmul.f32 %v3522_v22, %v1134_v31  ;;  %v1387_v32 = vsel %vm1258_vm7, %v1130_v25, %v1323_v30  ;;  %1718 = vrot.lane.b32.xlu0 %v3552_v2, %s4458_s16  ;;  %1680 = vrot.lane.b32.xlu1 %v3571_v35, %s4457_s21 }
 0x23a   : > { %v1388_v15 = vsel %vm1259_vm9, %v1132_v28, %v1324_v19 }
 0x23b   : > { %v1137_v23 = vpop.f32.mrb[24].mxu0  ;;  %v1389_v33 = vsel %vm1260_vm10, %v1134_v31, %v1325_v20  ;;  %v2711_v34 = vpack.c.bf16 %v1388_v15, %v1386_v21  ;;  %v778_v31 = vpop.permute.xlu1 %777 }
 0x23c   : > { %v1138_v36 = vadd.f32 %v1137_v23, %v753_v16  ;;  %v1139_v37 = vpop.f32.mrb[25].mxu0  ;;  %v2709_v38 = vpack.c.bf16 %v1389_v33, %v1387_v32 }
 0x23d   : > { %v1140_v40 = vadd.f32 %v1139_v37, %v753_v16  ;;  %v1141_v41 = vpop.f32.mrb[26].mxu0  ;;  %1731 = vrot.lane.b32.xlu0 %v3571_v35, %s4459_s18  ;;  %1684 = vrot.lane.b32.xlu1 %v3552_v2, %s4457_s21  ;;  %s2504_s21 = sshll.u32 %s321_s17, 4  ;;  %s4359_s21 = int_to_ptr.vmem [resolvable:$true] %s2504_s21 }
 0x23e   : > { %v1326_v42 = vmul.f32 %v3522_v22, %v1138_v36  ;;  %v1142_v43 = vadd.f32 %v1141_v41, %v758_v39  ;;  %v1143_v44 = vpop.f32.mrb[27].mxu0  ;;  %2710 = vmatprep.subr.bf16.mxu1 %v2709_v38  ;;  %vm1261_vm6 = vcmp.ge.f32.partialorder %v1138_v36, 0.0  ;;  %v783_v38 = vpop.permute.xlu0 %782  ;;  %s2922_s22 = scalar_lea.vmem %s4359_s21, 512  ;;  %p2929_p1 = scmp.lt.s32.totalorder %s4359_s21, %s2927_s9 }
 0x23f   : > { %v1327_v45 = vmul.f32 %v3522_v22, %v1140_v40  ;;  %v1144_v46 = vadd.f32 %v1143_v44, %v758_v39  ;;  %2712 = vmatpush1.bf16.msra.mxu1 %v2711_v34  ;;  %vm1262_vm8 = vcmp.ge.f32.partialorder %v1140_v40, 0.0  ;;  %p2923_p12 = scmp.ne.s32.totalorder %s4359_s21, %s2922_s22  ;;  %p2930_p2 = scmp.lt.s32.totalorder %s2928_s13, %s2922_s22 }
 0x240   : > { %vm1263_vm7 = vcmp.ge.f32.partialorder %v1142_v43, 0.0  ;;  %v1328_v47 = vmul.f32 %v3522_v22, %v1142_v43  ;;  %v1390_v49 = vsel %vm1261_vm6, %v1138_v36, %v1326_v42 }
 0x241   : > { %vm1264_vm9 = vcmp.ge.f32.partialorder %v1144_v46, 0.0  ;;  %v1329_v48 = vmul.f32 %v3522_v22, %v1144_v46  ;;  %v1391_v53 = vsel %vm1262_vm8, %v1140_v40, %v1327_v45  ;;  %1742 = vrot.lane.b32.xlu0 %v3571_v35, %s4460_s20  ;;  %1716 = vrot.lane.b32.xlu1 %v3152_v11, %s4458_s16  ;;  %p2924_p13 = pnand %p2923_p12, %p3101_p4  ;;  %p2931_p3 = por %p2930_p2, %p2929_p1 }
 0x242   : > { %v1392_v50 = vsel %vm1263_vm7, %v1142_v43, %v1328_v47 }
 0x243   : > { %v1147_v52 = vpop.f32.mrb[28].mxu0  ;;  %v1393_v54 = vsel %vm1264_vm9, %v1144_v46, %v1329_v48  ;;  %v2715_v55 = vpack.c.bf16 %v1392_v50, %v1390_v49  ;;  %v788_v46 = vpop.permute.xlu1 %787  ;;  %p2925_p0 = pneg %p2924_p13 }
 0x244   : > { %v1148_v56 = vadd.f32 %v1147_v52, %v763_v51  ;;  %v1149_v57 = vpop.f32.mrb[29].mxu0  ;;  %v2713_v58 = vpack.c.bf16 %v1393_v54, %v1391_v53 }
 0x245   : > { %v1150_v60 = vadd.f32 %v1149_v57, %v763_v51  ;;  %v1151_v61 = vpop.f32.mrb[30].mxu0  ;;  %1746 = vrot.lane.b32.xlu0 %v3552_v2, %s4460_s20  ;;  %1729 = vrot.lane.b32.xlu1 %v3549_v1, %s4459_s18  ;;  %v793_v57 = vpop.permute.xlu0 %792  ;;  %p2932_p5 = pnand %p2931_p3, %p2925_p0 }
 0x246   : > { %v1330_v62 = vmul.f32 %v3522_v22, %v1148_v56  ;;  %v1152_v63 = vadd.f32 %v1151_v61, %v768_v59  ;;  %v1153_v3 = vpop.f32.mrb[31].mxu0  ;;  %2714 = vmatprep.subr.bf16.mxu1 %v2713_v58  ;;  %vm1265_vm10 = vcmp.ge.f32.partialorder %v1148_v56, 0.0 }
 0x247   : > { %v1331_v4 = vmul.f32 %v3522_v22, %v1150_v60  ;;  %v1154_v5 = vadd.f32 %v1153_v3, %v768_v59  ;;  %2716 = vmatpush1.bf16.msra.mxu1 %v2715_v55  ;;  %vm1266_vm6 = vcmp.ge.f32.partialorder %v1150_v60, 0.0  ;;  %v798_v3 = vpop.permute.xlu1 %797 }
 0x248   : > { %vm1267_vm8 = vcmp.ge.f32.partialorder %v1152_v63, 0.0  ;;  %v1332_v12 = vmul.f32 %v3522_v22, %v1152_v63  ;;  %v1394_v14 = vsel %vm1265_vm10, %v1148_v56, %v1330_v62 }
 0x249   : > { %vm1268_vm7 = vcmp.ge.f32.partialorder %v1154_v5, 0.0  ;;  %v1333_v13 = vmul.f32 %v3522_v22, %v1154_v5  ;;  %v1395_v25 = vsel %vm1266_vm6, %v1150_v60, %v1331_v4  ;;  %1733 = vrot.lane.b32.xlu1 %v3560_v10, %s4459_s18 }
 0x24a   : > { %v1396_v17 = vsel %vm1267_vm8, %v1152_v63, %v1332_v12 }
 0x24b   : > { %v1157_v24 = vpop.f32.mrb[32].mxu0  ;;  %v1397_v26 = vsel %vm1268_vm7, %v1154_v5, %v1333_v13  ;;  %v2719_v27 = vpack.c.bf16 %v1396_v17, %v1394_v14 }
 0x24c   : > { %v1158_v28 = vadd.f32 %v1157_v24, %v773_v18  ;;  %v1159_v29 = vpop.f32.mrb[33].mxu0  ;;  %v2717_v30 = vpack.c.bf16 %v1397_v26, %v1395_v25  ;;  %v803_v26 = vpop.permute.xlu0 %802 }
 0x24d   : > { %v1160_v19 = vadd.f32 %v1159_v29, %v773_v18  ;;  %v1161_v20 = vpop.f32.mrb[34].mxu0  ;;  %1744 = vrot.lane.b32.xlu1 %v3152_v11, %s4460_s20  ;;  %s4357_s20 = scalar_lea.hbm %s4417_s7, %s2688_s19 }
 0x24e   : > { %v1334_v21 = vmul.f32 %v3522_v22, %v1158_v28  ;;  %v1162_v15 = vadd.f32 %v1161_v20, %v778_v31  ;;  %v1163_v16 = vpop.f32.mrb[35].mxu0  ;;  %2718 = vmatprep.subr.bf16.mxu1 %v2717_v30  ;;  %vm1269_vm9 = vcmp.ge.f32.partialorder %v1158_v28, 0.0 }
 0x24f   : > { %v1335_v23 = vmul.f32 %v3522_v22, %v1160_v19  ;;  %v1164_v32 = vadd.f32 %v1163_v16, %v778_v31  ;;  %2720 = vmatpush1.bf16.msra.mxu1 %v2719_v27  ;;  %vm1270_vm10 = vcmp.ge.f32.partialorder %v1160_v19, 0.0 }
 0x250   : > { %vm1271_vm6 = vcmp.ge.f32.partialorder %v1162_v15, 0.0  ;;  %v1336_v33 = vmul.f32 %v3522_v22, %v1162_v15  ;;  %v1398_v36 = vsel %vm1269_vm9, %v1158_v28, %v1334_v21  ;;  %v808_v21 = vpop.permute.xlu1 %807 }
 0x251   : > { %vm1272_vm8 = vcmp.ge.f32.partialorder %v1164_v32, 0.0  ;;  %v1337_v34 = vmul.f32 %v3522_v22, %v1164_v32  ;;  %v1399_v40 = vsel %vm1270_vm10, %v1160_v19, %v1335_v23 }
 0x252   : > { %v1400_v37 = vsel %vm1271_vm6, %v1162_v15, %v1336_v33 }
 0x253   : > { %v1167_v39 = vpop.f32.mrb[36].mxu0  ;;  %v1401_v41 = vsel %vm1272_vm8, %v1164_v32, %v1337_v34  ;;  %v2723_v42 = vpack.c.bf16 %v1400_v37, %v1398_v36 }
 0x254   : > { %v1168_v43 = vadd.f32 %v1167_v39, %v783_v38  ;;  %v1169_v44 = vpop.f32.mrb[37].mxu0  ;;  %v2721_v45 = vpack.c.bf16 %v1401_v41, %v1399_v40  ;;  %v813_v40 = vpop.permute.xlu0 %812 }
 0x255   : > { %v1170_v47 = vadd.f32 %v1169_v44, %v783_v38  ;;  %v1171_v48 = vpop.f32.mrb[38].mxu0 }
 0x256   : > { %v1338_v49 = vmul.f32 %v3522_v22, %v1168_v43  ;;  %v1172_v50 = vadd.f32 %v1171_v48, %v788_v46  ;;  %v1173_v51 = vpop.f32.mrb[39].mxu0  ;;  %2722 = vmatprep.subr.bf16.mxu1 %v2721_v45  ;;  %vm1273_vm7 = vcmp.ge.f32.partialorder %v1168_v43, 0.0  ;;  %v818_v48 = vpop.permute.xlu1 %817 }
 0x257   : > { %v1339_v52 = vmul.f32 %v3522_v22, %v1170_v47  ;;  %v1174_v53 = vadd.f32 %v1173_v51, %v788_v46  ;;  %2724 = vmatpush1.bf16.msra.mxu1 %v2723_v42  ;;  %vm1274_vm9 = vcmp.ge.f32.partialorder %v1170_v47, 0.0 }
 0x258   : > { %vm1275_vm10 = vcmp.ge.f32.partialorder %v1172_v50, 0.0  ;;  %v1340_v35 = vmul.f32 %v3522_v22, %v1172_v50  ;;  %v1402_v55 = vsel %vm1273_vm7, %v1168_v43, %v1338_v49 }
 0x259   : > { %vm1276_vm6 = vcmp.ge.f32.partialorder %v1174_v53, 0.0  ;;  %v1341_v54 = vmul.f32 %v3522_v22, %v1174_v53  ;;  %v1403_v59 = vsel %vm1274_vm9, %v1170_v47, %v1339_v52 }
 0x25a   : > { %v1404_v56 = vsel %vm1275_vm10, %v1172_v50, %v1340_v35 }
 0x25b   : > { %v1177_v58 = vpop.f32.mrb[40].mxu0  ;;  %v1405_v60 = vsel %vm1276_vm6, %v1174_v53, %v1341_v54  ;;  %v2727_v61 = vpack.c.bf16 %v1404_v56, %v1402_v55 }
 0x25c   : > { %v1178_v62 = vadd.f32 %v1177_v58, %v793_v57  ;;  %v1179_v63 = vpop.f32.mrb[41].mxu0  ;;  %v2725_v2 = vpack.c.bf16 %v1405_v60, %v1403_v59  ;;  %v823_v59 = vpop.permute.xlu0 %822 }
 0x25d   : > { %v1180_v4 = vadd.f32 %v1179_v63, %v793_v57  ;;  %v1181_v5 = vpop.f32.mrb[42].mxu0 }
 0x25e   : > { %v1342_v1 = vmul.f32 %v3522_v22, %v1178_v62  ;;  %v1182_v12 = vadd.f32 %v1181_v5, %v798_v3  ;;  %v1183_v13 = vpop.f32.mrb[43].mxu0  ;;  %2726 = vmatprep.subr.bf16.mxu1 %v2725_v2  ;;  %vm1277_vm8 = vcmp.ge.f32.partialorder %v1178_v62, 0.0  ;;  %v828_v5 = vpop.permute.xlu1 %827 }
 0x25f   : > { %v1343_v14 = vmul.f32 %v3522_v22, %v1180_v4  ;;  %v1184_v17 = vadd.f32 %v1183_v13, %v798_v3  ;;  %2728 = vmatpush1.bf16.msra.mxu1 %v2727_v61  ;;  %vm1278_vm7 = vcmp.ge.f32.partialorder %v1180_v4, 0.0 }
 0x260   : > { %vm1279_vm9 = vcmp.ge.f32.partialorder %v1182_v12, 0.0  ;;  %v1344_v18 = vmul.f32 %v3522_v22, %v1182_v12  ;;  %v1406_v24 = vsel %vm1277_vm8, %v1178_v62, %v1342_v1 }
 0x261   : > { %vm1280_vm10 = vcmp.ge.f32.partialorder %v1184_v17, 0.0  ;;  %v1345_v10 = vmul.f32 %v3522_v22, %v1184_v17  ;;  %v1407_v28 = vsel %vm1278_vm7, %v1180_v4, %v1343_v14 }
 0x262   : > { %v1408_v25 = vsel %vm1279_vm9, %v1182_v12, %v1344_v18 }
 0x263   : > { %v1187_v27 = vpop.f32.mrb[44].mxu0  ;;  %v1409_v29 = vsel %vm1280_vm10, %v1184_v17, %v1345_v10  ;;  %v2731_v30 = vpack.c.bf16 %v1408_v25, %v1406_v24 }
 0x264   : > { %v1188_v31 = vadd.f32 %v1187_v27, %v803_v26  ;;  %v1189_v19 = vpop.f32.mrb[45].mxu0  ;;  %v2729_v20 = vpack.c.bf16 %v1409_v29, %v1407_v28  ;;  %v833_v28 = vpop.permute.xlu0 %832 }
 0x265   : > { %v1190_v15 = vadd.f32 %v1189_v19, %v803_v26  ;;  %v1191_v16 = vpop.f32.mrb[46].mxu0 }
 0x266   : > { %v1346_v23 = vmul.f32 %v3522_v22, %v1188_v31  ;;  %v1192_v32 = vadd.f32 %v1191_v16, %v808_v21  ;;  %v1193_v11 = vpop.f32.mrb[47].mxu0  ;;  %2730 = vmatprep.subr.bf16.mxu1 %v2729_v20  ;;  %vm1281_vm6 = vcmp.ge.f32.partialorder %v1188_v31, 0.0  ;;  %v838_v16 = vpop.permute.xlu1 %837 }
 0x267   : > { %v1347_v33 = vmul.f32 %v3522_v22, %v1190_v15  ;;  %v1194_v34 = vadd.f32 %v1193_v11, %v808_v21  ;;  %2732 = vmatpush1.bf16.msra.mxu1 %v2731_v30  ;;  %vm1282_vm8 = vcmp.ge.f32.partialorder %v1190_v15, 0.0 }
 0x268   : > { %vm1283_vm7 = vcmp.ge.f32.partialorder %v1192_v32, 0.0  ;;  %v1348_v36 = vmul.f32 %v3522_v22, %v1192_v32  ;;  %v1410_v38 = vsel %vm1281_vm6, %v1188_v31, %v1346_v23 }
 0x269   : > { %vm1284_vm9 = vcmp.ge.f32.partialorder %v1194_v34, 0.0  ;;  %v1349_v37 = vmul.f32 %v3522_v22, %v1194_v34  ;;  %v1411_v42 = vsel %vm1282_vm8, %v1190_v15, %v1347_v33 }
 0x26a   : > { %v1412_v39 = vsel %vm1283_vm7, %v1192_v32, %v1348_v36 }
 0x26b   : > { %v1197_v41 = vpop.f32.mrb[48].mxu0  ;;  %v1413_v43 = vsel %vm1284_vm9, %v1194_v34, %v1349_v37  ;;  %v2735_v44 = vpack.c.bf16 %v1412_v39, %v1410_v38 }
 0x26c   : > { %v1198_v45 = vadd.f32 %v1197_v41, %v813_v40  ;;  %v1199_v46 = vpop.f32.mrb[49].mxu0  ;;  %v2733_v47 = vpack.c.bf16 %v1413_v43, %v1411_v42  ;;  %v843_v42 = vpop.permute.xlu0 %842 }
 0x26d   : > { %v1200_v49 = vadd.f32 %v1199_v46, %v813_v40  ;;  %v1201_v50 = vpop.f32.mrb[50].mxu0 }
 0x26e   : > { %v1350_v51 = vmul.f32 %v3522_v22, %v1198_v45  ;;  %v1202_v52 = vadd.f32 %v1201_v50, %v818_v48  ;;  %v1203_v53 = vpop.f32.mrb[51].mxu0  ;;  %2734 = vmatprep.subr.bf16.mxu1 %v2733_v47  ;;  %vm1285_vm10 = vcmp.ge.f32.partialorder %v1198_v45, 0.0  ;;  %v848_v50 = vpop.permute.xlu1 %847 }
 0x26f   : > { %v1351_v35 = vmul.f32 %v3522_v22, %v1200_v49  ;;  %v1204_v54 = vadd.f32 %v1203_v53, %v818_v48  ;;  %2736 = vmatpush1.bf16.msra.mxu1 %v2735_v44  ;;  %vm1286_vm6 = vcmp.ge.f32.partialorder %v1200_v49, 0.0 }
 0x270   : > { %vm1287_vm8 = vcmp.ge.f32.partialorder %v1202_v52, 0.0  ;;  %v1352_v55 = vmul.f32 %v3522_v22, %v1202_v52  ;;  %v1414_v57 = vsel %vm1285_vm10, %v1198_v45, %v1350_v51 }
 0x271   : > { %vm1288_vm7 = vcmp.ge.f32.partialorder %v1204_v54, 0.0  ;;  %v1353_v56 = vmul.f32 %v3522_v22, %v1204_v54  ;;  %v1415_v61 = vsel %vm1286_vm6, %v1200_v49, %v1351_v35 }
 0x272   : > { %v1416_v58 = vsel %vm1287_vm8, %v1202_v52, %v1352_v55 }
 0x273   : > { %v1207_v60 = vpop.f32.mrb[52].mxu0  ;;  %v1417_v62 = vsel %vm1288_vm7, %v1204_v54, %v1353_v56  ;;  %v2739_v63 = vpack.c.bf16 %v1416_v58, %v1414_v57 }
 0x274   : > { %v1208_v2 = vadd.f32 %v1207_v60, %v823_v59  ;;  %v1209_v3 = vpop.f32.mrb[53].mxu0  ;;  %v2737_v4 = vpack.c.bf16 %v1417_v62, %v1415_v61 }
 0x275   : > { %v1210_v1 = vadd.f32 %v1209_v3, %v823_v59  ;;  %v1211_v12 = vpop.f32.mrb[54].mxu0  ;;  %v3649_v59 = vpop.permute.xlu0 %1459 }
 0x276   : > { %v1354_v13 = vmul.f32 %v3522_v22, %v1208_v2  ;;  %v1212_v14 = vadd.f32 %v1211_v12, %v828_v5  ;;  %v1213_v17 = vpop.f32.mrb[55].mxu0  ;;  %2738 = vmatprep.subr.bf16.mxu1 %v2737_v4  ;;  %vm1289_vm9 = vcmp.ge.f32.partialorder %v1208_v2, 0.0  ;;  %v1430_v4 = vld [vmem:[%s4415_s5] sm:$0xff]  ;;  %v1432_v12 = vld [vmem:[%s4415_s5 + $0x10] sm:$0xff] }
 0x277   : > { %v1355_v18 = vmul.f32 %v3522_v22, %v1210_v1  ;;  %v1214_v10 = vadd.f32 %v1213_v17, %v828_v5  ;;  %2740 = vmatpush1.bf16.msra.mxu1 %v2739_v63  ;;  %vm1290_vm10 = vcmp.ge.f32.partialorder %v1210_v1, 0.0  ;;  %v3654_v5 = vpop.permute.xlu1 %1464 }
 0x278   : > { %vm1291_vm6 = vcmp.ge.f32.partialorder %v1212_v14, 0.0  ;;  %v1356_v24 = vmul.f32 %v3522_v22, %v1212_v14  ;;  %v1418_v26 = vsel %vm1289_vm9, %v1208_v2, %v1354_v13  ;;  %v1435_v13 = vld [vmem:[%s4415_s5 + $0x28] sm:$0xff] }
 0x279   : > { %vm1292_vm8 = vcmp.ge.f32.partialorder %v1214_v10, 0.0  ;;  %v1357_v25 = vmul.f32 %v3522_v22, %v1214_v10  ;;  %v1419_v30 = vsel %vm1290_vm10, %v1210_v1, %v1355_v18  ;;  %v3656_v1 = vpop.permute.xlu0 %1469  ;;  %v1434_v18 = vld [vmem:[%s4415_s5 + $0x20] sm:$0xff] }
 0x27a   : > { %v1420_v27 = vsel %vm1291_vm6, %v1212_v14, %v1356_v24  ;;  %v1436_v24 = vld [vmem:[%s4415_s5 + $0x30] sm:$0xff] }
 0x27b   : > { %v1217_v29 = vpop.f32.mrb[56].mxu0  ;;  %v1421_v31 = vsel %vm1292_vm8, %v1214_v10, %v1357_v25  ;;  %v2743_v19 = vpack.c.bf16 %v1420_v27, %v1418_v26  ;;  %v3667_v14 = vpop.permute.xlu1 %1474  ;;  %v1437_v10 = vld [vmem:[%s4415_s5 + $0x38] sm:$0xff]  ;;  %v1439_v27 = vld [vmem:[%s4415_s5 + $0x48] sm:$0xff] }
 0x27c   : > { %v1218_v20 = vadd.f32 %v1217_v29, %v833_v28  ;;  %v1219_v21 = vpop.f32.mrb[57].mxu0  ;;  %v2741_v15 = vpack.c.bf16 %v1421_v31, %v1419_v30  ;;  %v1441_v29 = vld [vmem:[%s4415_s5 + $0x58] sm:$0xff] }
 0x27d   : > { %v1220_v23 = vadd.f32 %v1219_v21, %v833_v28  ;;  %v1221_v32 = vpop.f32.mrb[58].mxu0  ;;  %v3669_v17 = vpop.permute.xlu0 %1479  ;;  %v1438_v28 = vld [vmem:[%s4415_s5 + $0x40] sm:$0xff] }
 0x27e   : > { %v1358_v11 = vmul.f32 %v3522_v22, %v1218_v20  ;;  %v1222_v33 = vadd.f32 %v1221_v32, %v838_v16  ;;  %v1223_v34 = vpop.f32.mrb[59].mxu0  ;;  %2742 = vmatprep.subr.bf16.mxu1 %v2741_v15  ;;  %vm1293_vm7 = vcmp.ge.f32.partialorder %v1218_v20, 0.0  ;;  %v1445_v32 = vld [vmem:[%s4415_s5 + $0x78] sm:$0xff] }
 0x27f   : > { %v1359_v36 = vmul.f32 %v3522_v22, %v1220_v23  ;;  %v1224_v37 = vadd.f32 %v1223_v34, %v838_v16  ;;  %2744 = vmatpush1.bf16.msra.mxu1 %v2743_v19  ;;  %vm1294_vm9 = vcmp.ge.f32.partialorder %v1220_v23, 0.0  ;;  %v3680_v25 = vpop.permute.xlu1 %1484  ;;  %v1440_v19 = vld [vmem:[%s4415_s5 + $0x50] sm:$0xff]  ;;  %v1442_v16 = vld [vmem:[%s4415_s5 + $0x60] sm:$0xff] }
 0x280   : > { %vm1295_vm10 = vcmp.ge.f32.partialorder %v1222_v33, 0.0  ;;  %v1360_v38 = vmul.f32 %v3522_v22, %v1222_v33  ;;  %v1422_v40 = vsel %vm1293_vm7, %v1218_v20, %v1358_v11  ;;  %v1443_v20 = vld [vmem:[%s4415_s5 + $0x68] sm:$0xff] }
 0x281   : > { %vm1296_vm6 = vcmp.ge.f32.partialorder %v1224_v37, 0.0  ;;  %v1361_v39 = vmul.f32 %v3522_v22, %v1224_v37  ;;  %v1423_v44 = vsel %vm1294_vm9, %v1220_v23, %v1359_v36  ;;  %v3682_v26 = vpop.permute.xlu0 %1489  ;;  %v1447_v36 = vld [vmem:[%s4415_s5 + $0x88] sm:$0xff] }
 0x282   : > { %v1424_v41 = vsel %vm1295_vm10, %v1222_v33, %v1360_v38  ;;  %v1444_v33 = vld [vmem:[%s4415_s5 + $0x70] sm:$0xff] }
 0x283   : > { %v1227_v43 = vpop.f32.mrb[60].mxu0  ;;  %v1425_v45 = vsel %vm1296_vm6, %v1224_v37, %v1361_v39  ;;  %v2747_v46 = vpack.c.bf16 %v1424_v41, %v1422_v40  ;;  %v3693_v30 = vpop.permute.xlu1 %1494  ;;  %v1446_v37 = vld [vmem:[%s4415_s5 + $0x80] sm:$0xff] }
 0x284   : > { %v1228_v47 = vadd.f32 %v1227_v43, %v843_v42  ;;  %v1229_v48 = vpop.f32.mrb[61].mxu0  ;;  %v2745_v49 = vpack.c.bf16 %v1425_v45, %v1423_v44 }
 0x285   : > { %v1230_v51 = vadd.f32 %v1229_v48, %v843_v42  ;;  %v1231_v52 = vpop.f32.mrb[62].mxu0  ;;  %v3695_v31 = vpop.permute.xlu0 %1499 }
 0x286   : > { %v1362_v53 = vmul.f32 %v3522_v22, %v1228_v47  ;;  %v1232_v35 = vadd.f32 %v1231_v52, %v848_v50  ;;  %v1233_v54 = vpop.f32.mrb[63].mxu0  ;;  %2746 = vmatprep.subr.bf16.mxu1 %v2745_v49  ;;  %vm1297_vm8 = vcmp.ge.f32.partialorder %v1228_v47, 0.0 }
 0x287   : > { %v1363_v55 = vmul.f32 %v3522_v22, %v1230_v51  ;;  %v1234_v56 = vadd.f32 %v1233_v54, %v848_v50  ;;  %2748 = vmatpush1.bf16.msra.mxu1 %v2747_v46  ;;  %vm1298_vm7 = vcmp.ge.f32.partialorder %v1230_v51, 0.0 }
 0x288   : > { %vm1299_vm9 = vcmp.ge.f32.partialorder %v1232_v35, 0.0  ;;  %v1364_v57 = vmul.f32 %v3522_v22, %v1232_v35  ;;  %v1426_v60 = vsel %vm1297_vm8, %v1228_v47, %v1362_v53 }
 0x289   : > { %vm1300_vm10 = vcmp.ge.f32.partialorder %v1234_v56, 0.0  ;;  %v1365_v58 = vmul.f32 %v3522_v22, %v1234_v56  ;;  %v1427_v62 = vsel %vm1298_vm7, %v1230_v51, %v1363_v55  ;;  %v1433_v22 = vld [vmem:[%s4415_s5 + $0x18] sm:$0xff]  ;;  %v1634_v15 = vpop.permute.xlu0 %1633 }
 0x28a   : > { %v1428_v61 = vsel %vm1299_vm9, %v1232_v35, %v1364_v57 }
 0x28b   : > { %v1429_v63 = vsel %vm1300_vm10, %v1234_v56, %v1365_v58  ;;  %v2751_v2 = vpack.c.bf16 %v1428_v61, %v1426_v60 }
 0x28c   : > { %v2749_v3 = vpack.c.bf16 %v1429_v63, %v1427_v62 }
 0x28d   : > { %v1645_v38 = vpop.permute.xlu0 %1644 }
 0x28e   : > { %2750 = vmatprep.subr.bf16.mxu1 %v2749_v3 }
 0x28f   : > { %2752 = vmatpush1.bf16.msra.mxu1 %v2751_v2 }
 0x292   : > { %1567 = vmatmul.mubr.f32.vlgmr.msra.gmra.mrb[0].mxu1 %v1430_v4 }
 0x293   : > { %1572 = vmatprep.mubr.f32.mxu1 %v1433_v22  ;;  %v1632_v21 = vpop.permute.xlu1 %1631  ;;  %v1649_v40 = vpop.permute.xlu0 %1648 }
 0x294   : > { %v1638_v23 = vsel %vm479_vm13, %v1632_v21, %v1634_v15 }
 0x295   : > { %1642 = vst [vmem:[#allocation2] sm:$0xf0] %v1638_v23 }
 0x296   : > { %1573 = vmatmul.mubr.f32.gmra.mrb[2].mxu1 %v1432_v12 }
 0x297   : > { %1578 = vmatprep.mubr.f32.mxu1 %v1435_v13  ;;  %v1636_v11 = vpop.permute.xlu1 %1635  ;;  %v1662_v46 = vpop.permute.xlu0 %1661 }
 0x298   : > { %v1639_v34 = vsel %vm479_vm13, %v1634_v15, %v1636_v11  ;;  %vm4461_vm13 = vcmask 769024  }
 0x299   : > { %1643 = vst [vmem:[#allocation2 + $0x8] sm:$0xf0] %v1639_v34 }
 0x29a   : > { %1579 = vmatmul.mubr.f32.gmra.mrb[4].mxu1 %v1434_v18 }
 0x29b   : > { %1584 = vmatprep.mubr.f32.mxu1 %v1437_v10  ;;  %v1647_v39 = vpop.permute.xlu1 %1646  ;;  %v1694_v51 = vpop.permute.xlu0 %1693 }
 0x29c   : > { %v1651_v41 = vsel %vm503_vm11, %v1645_v38, %v1647_v39  ;;  %v1652_v42 = vsel %vm503_vm11, %v1647_v39, %v1649_v40 }
 0x29d   : > { %v1655_v43 = vsel %vm3119_vm0, %v1651_v41, 0.0  ;;  %v1656_v44 = vsel %vm3132_vm2, %v1652_v42, 0.0 }
 0x29e   : > { %1585 = vmatmul.mubr.f32.gmra.mrb[6].mxu1 %v1436_v24  ;;  %1657 = vst [vmem:[#allocation2 + $0x10] sm:$0xf] %v1655_v43  ;;  %1658 = vst [vmem:[#allocation2 + $0x18] sm:$0xf] %v1656_v44  ;;  %v1784_v44 = vshrl.u32 %v350_v0, 7 }
 0x29f   : > { %1590 = vmatprep.mubr.f32.mxu1 %v1439_v27  ;;  %v1660_v45 = vpop.permute.xlu1 %1659  ;;  %v1698_v54 = vpop.permute.xlu0 %1697 }
 0x2a0   : > { %v1666_v47 = vsel %vm527_vm12, %v1660_v45, %v1662_v46 }
 0x2a1   : > { %v1670_v48 = vsel %vm3123_vm1, %v1666_v47, 0.0 }
 0x2a2   : > { %1591 = vmatmul.mubr.f32.gmra.mrb[8].mxu1 %v1438_v28  ;;  %v1674_v49 = vrot.slane %v1670_v48, 4 }
 0x2a3   : > { %1596 = vmatprep.mubr.f32.mxu1 %v1441_v29  ;;  %v1664_v50 = vpop.permute.xlu1 %1663  ;;  %v1683_v2 = vpop.permute.xlu0 %1682 }
 0x2a4   : > { %1678 = vst [vmem:[#allocation2 + $0x10] sm:$0xf0] %v1674_v49  ;;  %v1667_v52 = vsel %vm527_vm12, %v1662_v46, %v1664_v50  ;;  %v3779_v49 = vsub.s32 0, %v1784_v44  ;;  %v3781_v50 = vsub.s32 1, %v1784_v44 }
 0x2a5   : > { %v1671_v53 = vsel %vm3136_vm3, %v1667_v52, 0.0  ;;  %v3786_v52 = vld [vmem:[#allocation2] ss:$8 sm:$0x3] }
 0x2a6   : > { %1597 = vmatmul.mubr.f32.gmra.mrb[10].mxu1 %v1440_v19  ;;  %v1675_v55 = vrot.slane %v1671_v53, 4  ;;  %v3788_v53 = vld [vmem:[#allocation2 + $0x1] ss:$8 sm:$0x3] }
 0x2a7   : > { %1602 = vmatprep.mubr.f32.mxu1 %v1443_v20  ;;  %v1696_v35 = vpop.permute.xlu1 %1695  ;;  %v1715_v22 = vpop.permute.xlu0 %1714 }
 0x2a8   : > { %v1700_v56 = vsel %vm562_vm15, %v1694_v51, %v1696_v35  ;;  %v1701_v57 = vsel %vm562_vm15, %v1696_v35, %v1698_v54  ;;  %1679 = vst [vmem:[#allocation2 + $0x18] sm:$0xf0] %v1675_v55  ;;  %v3793_v35 = vld [vmem:[#allocation2 + $0x2] ss:$8 sm:$0x3] }
 0x2a9   : > { %v1704_v58 = vsel %vm3119_vm0, %v1700_v56, 0.0  ;;  %v1705_v60 = vsel %vm3132_vm2, %v1701_v57, 0.0  ;;  %v3795_v54 = vld [vmem:[#allocation2 + $0x3] ss:$8 sm:$0x3] }
 0x2aa   : > { %1603 = vmatmul.mubr.f32.gmra.mrb[12].mxu1 %v1442_v16  ;;  %v1708_v61 = vrot.slane %v1704_v58, 4  ;;  %v1709_v62 = vrot.slane %v1705_v60, 4  ;;  %v3798_v56 = vld [vmem:[#allocation2 + $0x4] ss:$8 sm:$0x3] }
 0x2ab   : > { %1608 = vmatprep.mubr.f32.mxu1 %v1445_v32  ;;  %v1681_v63 = vpop.permute.xlu1 %1680  ;;  %v1719_v18 = vpop.permute.xlu0 %1718 }
 0x2ac   : > { %1712 = vst [vmem:[#allocation2 + $0x20] sm:$0xf0] %v1708_v61  ;;  %1713 = vst [vmem:[#allocation2 + $0x28] sm:$0xf0] %v1709_v62  ;;  %v1687_v3 = vsel %vm538_vm14, %v1681_v63, %v1683_v2 }
 0x2ad   : > { %1691 = vst [vmem:[#allocation2 + $0x20] sm:$0xf] %v1687_v3  ;;  %v3805_v62 = vld [vmem:[#allocation2 + $0x5] ss:$8 sm:$0x3] }
 0x2ae   : > { %1609 = vmatmul.mubr.f32.gmra.mrb[14].mxu1 %v1444_v33 }
 0x2af   : > { %1614 = vmatprep.mubr.f32.mxu1 %v1447_v36  ;;  %v1685_v4 = vpop.permute.xlu1 %1684  ;;  %v1732_v19 = vpop.permute.xlu0 %1731 }
 0x2b0   : > { %v1688_v12 = vsel %vm538_vm14, %v1683_v2, %v1685_v4 }
 0x2b1   : > { %1692 = vst [vmem:[#allocation2 + $0x28] sm:$0xf] %v1688_v12  ;;  %v3818_v12 = vld [vmem:[#allocation2 + $0x7] ss:$8 sm:$0x3] }
 0x2b2   : > { %1615 = vmatmul.mubr.f32.gmra.mrb[16].mxu1 %v1446_v37 }
 0x2b3   : > { %v1717_v13 = vpop.permute.xlu1 %1716  ;;  %v1743_v16 = vpop.permute.xlu0 %1742 }
 0x2b4   : > { %v1721_v10 = vsel %vm586_vm4, %v1715_v22, %v1717_v13  ;;  %v1722_v24 = vsel %vm586_vm4, %v1717_v13, %v1719_v18  ;;  %v3816_v22 = vld [vmem:[#allocation2 + $0x6] ss:$8 sm:$0x3] }
 0x2b5   : > { %v1725_v27 = vsel %vm3123_vm1, %v1721_v10, 0.0  ;;  %v1726_v28 = vsel %vm3136_vm3, %v1722_v24, 0.0  ;;  %vm4462_vm1 = vmmov %vm4461_vm13 }
 0x2b6   : > { %1727 = vst [vmem:[#allocation2 + $0x30] sm:$0xf] %v1725_v27  ;;  %1728 = vst [vmem:[#allocation2 + $0x38] sm:$0xf] %v1726_v28 }
 0x2b7   : > { %v1730_v29 = vpop.permute.xlu1 %1729  ;;  %v1747_v32 = vpop.permute.xlu0 %1746  ;;  %v3829_v27 = vld [vmem:[#allocation2 + $0x10] ss:$8 sm:$0x3]  ;;  %v3831_v28 = vld [vmem:[#allocation2 + $0x11] ss:$8 sm:$0x3] }
 0x2b8   : > { %v1736_v20 = vsel %vm597_vm5, %v1730_v29, %v1732_v19  ;;  %v3919_v18 = vld [vmem:[#allocation2 + $0x21] ss:$8 sm:$0x3] }
 0x2b9   : > { %1740 = vst [vmem:[#allocation2 + $0x30] sm:$0xf0] %v1736_v20 }
 0x2bb   : > { %v1734_v21 = vpop.permute.xlu1 %1733 }
 0x2bc   : > { %v1737_v15 = vsel %vm597_vm5, %v1732_v19, %v1734_v21  ;;  %v3840_v21 = vld [vmem:[#allocation2 + $0x12] ss:$8 sm:$0x3] }
 0x2bd   : > { %1741 = vst [vmem:[#allocation2 + $0x38] sm:$0xf0] %v1737_v15  ;;  %v3963_v44 = vld [vmem:[#allocation2 + $0x33] ss:$8 sm:$0x3] }
 0x2bf   : > { %v1745_v23 = vpop.permute.xlu1 %1744 }
 0x2c0   : > { %v1749_v7 = vsel %vm4461_vm13, %v1743_v16, %v1745_v23  ;;  %v1750_v11 = vsel %vm4462_vm1, %v1745_v23, %v1747_v32  ;;  %v3906_v23 = vld [vmem:[#allocation2 + $0x27] ss:$8 sm:$0x3] }
 0x2c1   : > { %v1753_v9 = vsel %vm3119_vm0, %v1749_v7, 0.0  ;;  %v1754_v33 = vsel %vm3132_vm2, %v1750_v11, 0.0  ;;  %v3849_v11 = vld [vmem:[#allocation2 + $0x13] ss:$8 sm:$0x3] }
 0x2c2   : > { %1755 = vst [vmem:[#allocation2 + $0x40] sm:$0xf] %v1753_v9  ;;  %1756 = vst [vmem:[#allocation2 + $0x48] sm:$0xf] %v1754_v33 }
 0x2c3   : > { %v3904_v7 = vld [vmem:[#allocation2 + $0x26] ss:$8 sm:$0x3] }
 0x2c4   : > { %v3982_v20 = vld [vmem:[#allocation2 + $0x35] ss:$8 sm:$0x3] }
 0x365   : > { %v1568_v34 = vpop.f32.mrb[0].mxu1 }
 0x366   : > { %v1570_v36 = vpop.f32.mrb[1].mxu1  ;;  %v3755_v38 = vadd.f32 %v1568_v34, %v3649_v59  ;;  %v3973_v34 = vld [vmem:[#allocation2 + $0x34] ss:$8 sm:$0x3] }
 0x367   : > { %v3761_v41 = vadd.f32 %v1570_v36, %v3649_v59  ;;  %v3937_v36 = vld [vmem:[#allocation2 + $0x23] ss:$8 sm:$0x3]  ;;  %4463 = vst [vmem:[#allocation7_spill] sm:$0xff] %v3973_v34 }
 0x369   : > { %v1574_v37 = vpop.f32.mrb[2].mxu1 }
 0x36a   : > { %v3758_v39 = vadd.f32 %v1574_v37, %v3654_v5  ;;  %v1576_v40 = vpop.f32.mrb[3].mxu1 }
 0x36b   : > { %v3764_v6 = vadd.f32 %v1576_v40, %v3654_v5  ;;  %v3860_v40 = vld [vmem:[#allocation2 + $0x14] ss:$8 sm:$0x3] }
 0x36c   : > { %v1757_v8 = vmax.f32 %v3755_v38, %v3758_v39 }
 0x36d   : > { %v1758_v42 = vmax.f32 %v3761_v41, %v3764_v6  ;;  %v1580_v43 = vpop.f32.mrb[4].mxu1 }
 0x36e   : > { %v3772_v45 = vadd.f32 %v1580_v43, %v3656_v1  ;;  %v1582_v46 = vpop.f32.mrb[5].mxu1 }
 0x36f   : > { %v3775_v47 = vadd.f32 %v1582_v46, %v3656_v1  ;;  %v3893_v46 = vld [vmem:[#allocation2 + $0x25] ss:$8 sm:$0x3] }
 0x370   : > { %v1759_v59 = vmax.f32 %v1757_v8, %v3772_v45  ;;  %v3862_v8 = vld [vmem:[#allocation2 + $0x15] ss:$8 sm:$0x3] }
 0x371   : > { %v1760_v5 = vmax.f32 %v1758_v42, %v3775_v47  ;;  %v1586_v48 = vpop.f32.mrb[6].mxu1 }
 0x372   : > { %v3784_v51 = vadd.f32 %v1586_v48, %v3667_v14  ;;  %v1588_v0 = vpop.f32.mrb[7].mxu1 }
 0x373   : > { %v3791_v1 = vadd.f32 %v1588_v0, %v3667_v14 }
 0x374   : > { %v1761_v55 = vmax.f32 %v1759_v59, %v3784_v51  ;;  %v3873_v59 = vld [vmem:[#allocation2 + $0x16] ss:$8 sm:$0x3] }
 0x375   : > { %v1762_v57 = vmax.f32 %v1760_v5, %v3791_v1  ;;  %v1592_v58 = vpop.f32.mrb[8].mxu1  ;;  %v3875_v5 = vld [vmem:[#allocation2 + $0x17] ss:$8 sm:$0x3] }
 0x376   : > { %v3808_v14 = vadd.f32 %v1592_v58, %v3669_v17  ;;  %v1594_v63 = vpop.f32.mrb[9].mxu1 }
 0x377   : > { %v3821_v13 = vadd.f32 %v1594_v63, %v3669_v17 }
 0x378   : > { %v1763_v29 = vmax.f32 %v1761_v55, %v3808_v14  ;;  %v3948_v55 = vld [vmem:[#allocation2 + $0x30] ss:$8 sm:$0x3] }
 0x379   : > { %v1764_v15 = vmax.f32 %v1762_v57, %v3821_v13  ;;  %v1598_v16 = vpop.f32.mrb[10].mxu1  ;;  %v3884_v57 = vld [vmem:[#allocation2 + $0x24] ss:$8 sm:$0x3] }
 0x37a   : > { %v3852_v9 = vadd.f32 %v1598_v16, %v3680_v25  ;;  %v1600_v33 = vpop.f32.mrb[11].mxu1 }
 0x37b   : > { %v3865_v42 = vadd.f32 %v1600_v33, %v3680_v25 }
 0x37c   : > { %v1765_v48 = vmax.f32 %v1763_v29, %v3852_v9 }
 0x37d   : > { %v1766_v58 = vmax.f32 %v1764_v15, %v3865_v42  ;;  %v1604_v63 = vpop.f32.mrb[12].mxu1  ;;  %v3917_v15 = vld [vmem:[#allocation2 + $0x20] ss:$8 sm:$0x3] }
 0x37e   : > { %v3896_v25 = vadd.f32 %v1604_v63, %v3682_v26  ;;  %v1606_v43 = vpop.f32.mrb[13].mxu1  ;;  %v3928_v63 = vld [vmem:[#allocation2 + $0x22] ss:$8 sm:$0x3] }
 0x37f   : > { %v3909_v33 = vadd.f32 %v1606_v43, %v3682_v26 }
 0x380   : > { %v1767_v3 = vmax.f32 %v1765_v48, %v3896_v25  ;;  %v3950_v48 = vld [vmem:[#allocation2 + $0x31] ss:$8 sm:$0x3] }
 0x381   : > { %v1768_v17 = vmax.f32 %v1766_v58, %v3909_v33  ;;  %v1610_v24 = vpop.f32.mrb[14].mxu1  ;;  %v3961_v58 = vld [vmem:[#allocation2 + $0x32] ss:$8 sm:$0x3] }
 0x382   : > { %v3940_v26 = vadd.f32 %v1610_v24, %v3693_v30  ;;  %v1612_v43 = vpop.f32.mrb[15].mxu1 }
 0x383   : > { %v3953_v61 = vadd.f32 %v1612_v43, %v3693_v30 }
 0x384   : > { %v1769_v16 = vmax.f32 %v1767_v3, %v3940_v26  ;;  %v4012_v3 = vld [vmem:[#allocation2 + $0x36] ss:$8 sm:$0x3] }
 0x385   : > { %v1770_v0 = vmax.f32 %v1768_v17, %v3953_v61  ;;  %v1616_v24 = vpop.f32.mrb[16].mxu1 }
 0x386   : > { %v1617_v32 = vadd.f32 %v1616_v24, %v3695_v31  ;;  %v1618_v30 = vpop.f32.mrb[17].mxu1 }
 0x387   : > { %v3991_v19 = vadd.f32 %v1618_v30, %v3695_v31 }
 0x388   : > { %v1771_v10 = vmax.f32 %v1769_v16, %v1617_v32 }
 0x389   : > { %v4000_v17 = vmax.f32 %v1770_v0, %v3991_v19 }
 0x38a   : > { %v1773_v37 = vsub.f32 %v3755_v38, %v1771_v10  ;;  %v1848_v24 = vsub.f32 %v3758_v39, %v1771_v10  ;;  %v1924_v29 = vsub.f32 %v3772_v45, %v1771_v10  ;;  %v2000_v16 = vsub.f32 %v3784_v51, %v1771_v10 }
 0x38b   : > { %v2076_v0 = vsub.f32 %v3808_v14, %v1771_v10  ;;  %v2152_v43 = vsub.f32 %v3852_v9, %v1771_v10  ;;  %v2228_v4 = vsub.f32 %v3896_v25, %v1771_v10  ;;  %v2304_v31 = vsub.f32 %v3940_v26, %v1771_v10  ;;  %v4024_v14 = vld [vmem:[#allocation2 + $0x37] ss:$8 sm:$0x3] }
 0x38c   : > { %v1775_v2 = vmul.f32 1.442695, %v1773_v37  ;;  %v1850_v30 = vmul.f32 1.442695, %v1848_v24  ;;  %v1926_v60 = vmul.f32 1.442695, %v1924_v29  ;;  %v2380_v38 = vsub.f32 %v1617_v32, %v1771_v10 }
 0x38d   : > { %v2002_v34 = vmul.f32 1.442695, %v2000_v16  ;;  %v1774_v39 = vsub.f32 %v3761_v41, %v4000_v17  ;;  %v2078_v9 = vmul.f32 1.442695, %v2076_v0  ;;  %v2154_v25 = vmul.f32 1.442695, %v2152_v43 }
 0x38e   : > { %2881 = vpow2.f32 %v1775_v2  ;;  %v2230_v10 = vmul.f32 1.442695, %v2228_v4  ;;  %v1849_v32 = vsub.f32 %v3764_v6, %v4000_v17  ;;  %v1925_v41 = vsub.f32 %v3775_v47, %v4000_v17  ;;  %v4032_v29 = vld [vmem:[#allocation2 + $0x40] ss:$8 sm:$0x3] }
 0x38f   : > { %2883 = vpow2.f32 %v1850_v30  ;;  %4464 = vst [vmem:[#allocation8_spill] sm:$0xff] %v4032_v29  ;;  %v2001_v26 = vsub.f32 %v3791_v1, %v4000_v17  ;;  %v2077_v2 = vsub.f32 %v3821_v13, %v4000_v17  ;;  %v2153_v43 = vsub.f32 %v3865_v42, %v4000_v17  ;;  %v4044_v24 = vld [vmem:[#allocation2 + $0x41] ss:$8 sm:$0x3] }
 0x390   : > { %2885 = vpow2.f32 %v1926_v60  ;;  %v2306_v4 = vmul.f32 1.442695, %v2304_v31  ;;  %v2229_v6 = vsub.f32 %v3909_v33, %v4000_v17  ;;  %4465 = vst [vmem:[#allocation9_spill] sm:$0xff] %v4044_v24  ;;  %v2382_v60 = vmul.f32 1.442695, %v2380_v38 }
 0x391   : > { %2887 = vpow2.f32 %v2002_v34  ;;  %v4050_v30 = vld [vmem:[#allocation2 + $0x42] ss:$8 sm:$0x3]  ;;  %v1777_v34 = vmul.f32 1.442695, %v1774_v39  ;;  %v2305_v42 = vsub.f32 %v3953_v61, %v4000_v17  ;;  %v2381_v33 = vsub.f32 %v3991_v19, %v4000_v17 }
 0x392   : > { %2889 = vpow2.f32 %v2078_v9  ;;  %4466 = vst [vmem:[#allocation10_spill] sm:$0xff] %v4050_v30  ;;  %v4056_v31 = vld [vmem:[#allocation2 + $0x43] ss:$8 sm:$0x3]  ;;  %v1852_v16 = vmul.f32 1.442695, %v1849_v32 }
 0x393   : > { %2891 = vpow2.f32 %v2154_v25  ;;  %4467 = vst [vmem:[#allocation11_spill] sm:$0xff] %v4056_v31  ;;  %v1928_v9 = vmul.f32 1.442695, %v1925_v41  ;;  %v2004_v19 = vmul.f32 1.442695, %v2001_v26  ;;  %v4468_v26 = vrot.slane %v3786_v52, %v3779_v49 }
 0x394   : > { %2893 = vpow2.f32 %v2230_v10  ;;  %v2080_v10 = vmul.f32 1.442695, %v2077_v2  ;;  %v2156_v32 = vmul.f32 1.442695, %v2153_v43  ;;  %v2232_v39 = vmul.f32 1.442695, %v2229_v6 }
 0x395   : > { %2895 = vpow2.f32 %v2306_v4  ;;  %v2308_v38 = vmul.f32 1.442695, %v2305_v42  ;;  %v2384_v0 = vmul.f32 1.442695, %v2381_v33  ;;  %v4469_v25 = vrot.slane %v3788_v53, %v3779_v49 }
 0x396   : > { %2897 = vpow2.f32 %v2382_v60  ;;  %v4470_v2 = vrot.slane %v3793_v35, %v3779_v49  ;;  %v4471_v6 = vrot.slane %v3795_v54, %v3779_v49  ;;  %v4472_v33 = vrot.slane %v3798_v56, %v3779_v49 }
 0x397   : > { %2899 = vpow2.f32 %v1777_v34 }
 0x398   : > { %v2882_v4 = vpop.eup %2881  ;;  %2901 = vpow2.f32 %v1852_v16 }
 0x399   : > { %v2884_v61 = vpop.eup %2883  ;;  %2903 = vpow2.f32 %v1928_v9  ;;  %v1793_v60 = vmul.f32 %v2882_v4, %v4468_v26  ;;  %v1810_v34 = vmul.f32 %v2882_v4, %v4469_v25  ;;  %v1827_v43 = vmul.f32 %v2882_v4, %v4470_v2 }
 0x39a   : > { %v2886_v41 = vpop.eup %2885  ;;  %v1854_v17 = vadd.f32 %v2884_v61, %v2882_v4  ;;  %2905 = vpow2.f32 %v2004_v19  ;;  %v1844_v42 = vmul.f32 %v2882_v4, %v4471_v6  ;;  %v1869_v16 = vmul.f32 %v2884_v61, %v4472_v33 }
 0x39b   : > { %v2888_v9 = vpop.eup %2887  ;;  %2907 = vpow2.f32 %v2080_v10  ;;  %v4473_v25 = vrot.slane %v3805_v62, %v3779_v49  ;;  %v4474_v2 = vrot.slane %v3816_v22, %v3779_v49  ;;  %v4475_v19 = vrot.slane %v3818_v12, %v3779_v49 }
 0x39c   : > { %v4096_v47 = vpop.eup %2889  ;;  %v1930_v4 = vadd.f32 %v2886_v41, %v1854_v17  ;;  %2909 = vpow2.f32 %v2156_v32  ;;  %v1871_v6 = vadd.f32 %v1869_v16, %v1793_v60  ;;  %v4476_v10 = vrot.slane %v3829_v27, %v3779_v49 }
 0x39d   : > { %v1886_v26 = vmul.f32 %v2884_v61, %v4473_v25  ;;  %v1903_v13 = vmul.f32 %v2884_v61, %v4474_v2  ;;  %v1920_v1 = vmul.f32 %v2884_v61, %v4475_v19  ;;  %v4101_v37 = vpop.eup %2891  ;;  %2911 = vpow2.f32 %v2232_v39 }
 0x39e   : > { %v1945_v33 = vmul.f32 %v2886_v41, %v4476_v10  ;;  %v4103_v2 = vpop.eup %2893  ;;  %v2006_v31 = vadd.f32 %v2888_v9, %v1930_v4  ;;  %2913 = vpow2.f32 %v2308_v38  ;;  %v4477_v17 = vrot.slane %v3831_v28, %v3779_v49 }
 0x39f   : > { %v1888_v25 = vadd.f32 %v1886_v26, %v1810_v34  ;;  %v1905_v51 = vadd.f32 %v1903_v13, %v1827_v43  ;;  %v1922_v45 = vadd.f32 %v1920_v1, %v1844_v42  ;;  %v4108_v60 = vpop.eup %2895  ;;  %2915 = vpow2.f32 %v2384_v0 }
 0x3a0   : > { %v1947_v61 = vadd.f32 %v1945_v33, %v1871_v6  ;;  %v1962_v32 = vmul.f32 %v2886_v41, %v4477_v17  ;;  %v4478_v16 = vrot.slane %v3840_v21, %v3779_v49  ;;  %v4479_v13 = vrot.slane %v3849_v11, %v3779_v49  ;;  %v4119_v34 = vpop.eup %2897 }
 0x3a1   : > { %v4480_v39 = vrot.slane %v3860_v40, %v3779_v49  ;;  %v2082_v43 = vadd.f32 %v4096_v47, %v2006_v31  ;;  %v4481_v0 = vrot.slane %v3862_v8, %v3779_v49  ;;  %v4482_v4 = vrot.slane %v3873_v59, %v3779_v49  ;;  %v2900_v10 = vpop.eup %2899 }
 0x3a2   : > { %v1979_v19 = vmul.f32 %v2886_v41, %v4478_v16  ;;  %v1996_v1 = vmul.f32 %v2886_v41, %v4479_v13  ;;  %v1964_v42 = vadd.f32 %v1962_v32, %v1888_v25  ;;  %v4483_v16 = vrot.slane %v3875_v5, %v3779_v49 }
 0x3a3   : > { %v2021_v38 = vmul.f32 %v2888_v9, %v4480_v39  ;;  %v2038_v26 = vmul.f32 %v2888_v9, %v4481_v0  ;;  %v2055_v6 = vmul.f32 %v2888_v9, %v4482_v4  ;;  %v2902_v39 = vpop.eup %2901  ;;  %v2158_v31 = vadd.f32 %v4101_v37, %v2082_v43 }
 0x3a4   : > { %v1981_v33 = vadd.f32 %v1979_v19, %v1905_v51  ;;  %v1998_v41 = vadd.f32 %v1996_v1, %v1922_v45  ;;  %v2072_v13 = vmul.f32 %v2888_v9, %v4483_v16  ;;  %v4484_v25 = vrot.slane %v3786_v52, %v3781_v50 }
 0x3a5   : > { %v2023_v17 = vadd.f32 %v2021_v38, %v1947_v61  ;;  %v4485_v0 = vrot.slane %v3788_v53, %v3781_v50  ;;  %v4486_v51 = vrot.slane %v3793_v35, %v3781_v50  ;;  %v2904_v61 = vpop.eup %2903  ;;  %v1855_v19 = vadd.f32 %v2902_v39, %v2900_v10 }
 0x3a6   : > { %v1794_v32 = vmul.f32 %v2900_v10, %v4484_v25  ;;  %v4487_v9 = vrot.slane %v3795_v54, %v3781_v50  ;;  %v4488_v38 = vrot.slane %v3798_v56, %v3781_v50  ;;  %v4489_v52 = vrot.slane %v3805_v62, %v3781_v50  ;;  %v2906_v53 = vpop.eup %2905 }
 0x3a7   : > { %v1811_v30 = vmul.f32 %v2900_v10, %v4485_v0  ;;  %v1828_v45 = vmul.f32 %v2900_v10, %v4486_v51  ;;  %v2234_v16 = vadd.f32 %v4103_v2, %v2158_v31  ;;  %v4490_v35 = vrot.slane %v3816_v22, %v3781_v50  ;;  %v2908_v51 = vpop.eup %2907 }
 0x3a8   : > { %v1845_v1 = vmul.f32 %v2900_v10, %v4487_v9  ;;  %v1870_v43 = vmul.f32 %v2902_v39, %v4488_v38  ;;  %v1887_v4 = vmul.f32 %v2902_v39, %v4489_v52  ;;  %v4491_v0 = vrot.slane %v3818_v12, %v3781_v50  ;;  %v2910_v24 = vpop.eup %2909 }
 0x3a9   : > { %v1904_v25 = vmul.f32 %v2902_v39, %v4490_v35  ;;  %v4492_v10 = vrot.slane %v3829_v27, %v3781_v50  ;;  %v1931_v9 = vadd.f32 %v2904_v61, %v1855_v19  ;;  %v4493_v52 = vrot.slane %v3831_v28, %v3781_v50 }
 0x3aa   : > { %v1921_v54 = vmul.f32 %v2902_v39, %v4491_v0  ;;  %v1872_v38 = vadd.f32 %v1870_v43, %v1794_v32  ;;  %v1889_v62 = vadd.f32 %v1887_v4, %v1811_v30  ;;  %v2310_v22 = vadd.f32 %v4108_v60, %v2234_v16  ;;  %v4167_v0 = vpop.eup %2911 }
 0x3ab   : > { %v1946_v56 = vmul.f32 %v2904_v61, %v4492_v10  ;;  %v1963_v31 = vmul.f32 %v2904_v61, %v4493_v52  ;;  %v1906_v35 = vadd.f32 %v1904_v25, %v1828_v45  ;;  %v4494_v12 = vrot.slane %v3840_v21, %v3781_v50  ;;  %v4172_v28 = vpop.eup %2913 }
 0x3ac   : > { %v1923_v29 = vadd.f32 %v1921_v54, %v1845_v1  ;;  %v2007_v27 = vadd.f32 %v2906_v53, %v1931_v9  ;;  %v4495_v30 = vrot.slane %v3849_v11, %v3781_v50  ;;  %v2386_v43 = vadd.f32 %v4119_v34, %v2310_v22  ;;  %v4181_v25 = vpop.eup %2915 }
 0x3ad   : > { %v1980_v39 = vmul.f32 %v2904_v61, %v4494_v12  ;;  %v1948_v10 = vadd.f32 %v1946_v56, %v1872_v38  ;;  %v1965_v19 = vadd.f32 %v1963_v31, %v1889_v62  ;;  %v4496_v45 = vrot.slane %v3860_v40, %v3781_v50 }
 0x3ae   : > { %v1997_v32 = vmul.f32 %v2904_v61, %v4495_v30  ;;  %v4497_v21 = vrot.slane %v3862_v8, %v3781_v50  ;;  %v2083_v54 = vadd.f32 %v2908_v51, %v2007_v27  ;;  %v2040_v9 = vadd.f32 %v2038_v26, %v1964_v42 }
 0x3af   : > { %v1982_v4 = vadd.f32 %v1980_v39, %v1906_v35  ;;  %v2022_v1 = vmul.f32 %v2906_v53, %v4496_v45  ;;  %v4498_v11 = vrot.slane %v3873_v59, %v3781_v50  ;;  %2917 = vrcp.f32 %v2386_v43 }
 0x3b0   : > { %v2039_v16 = vmul.f32 %v2906_v53, %v4497_v21  ;;  %v1999_v56 = vadd.f32 %v1997_v32, %v1923_v29  ;;  %v2057_v52 = vadd.f32 %v2055_v6, %v1981_v33  ;;  %v2159_v31 = vadd.f32 %v2910_v24, %v2083_v54 }
 0x3b1   : > { %v2056_v61 = vmul.f32 %v2906_v53, %v4498_v11  ;;  %v2024_v38 = vadd.f32 %v2022_v1, %v1948_v10  ;;  %v4499_v22 = vrot.slane %v3875_v5, %v3781_v50  ;;  %v2074_v35 = vadd.f32 %v2072_v13, %v1998_v41 }
 0x3b2   : > { %v2041_v62 = vadd.f32 %v2039_v16, %v1965_v19  ;;  %v4500_v12 = vrot.slane %v3917_v15, %v3779_v49  ;;  %v4501_v59 = vrot.slane %v3917_v15, %v3781_v50  ;;  %v4502_v26 = vrot.slane %v3919_v18, %v3779_v49 }
 0x3b3   : > { %v2058_v40 = vadd.f32 %v2056_v61, %v1982_v4  ;;  %v2073_v8 = vmul.f32 %v2906_v53, %v4499_v22  ;;  %v4503_v33 = vrot.slane %v3919_v18, %v3781_v50  ;;  %v2235_v41 = vadd.f32 %v4167_v0, %v2159_v31 }
 0x3b4   : > { %v2097_v29 = vmul.f32 %v4096_v47, %v4500_v12  ;;  %v2098_v42 = vmul.f32 %v2908_v51, %v4501_v59  ;;  %v2114_v6 = vmul.f32 %v4096_v47, %v4502_v26  ;;  %v4504_v53 = vrot.slane %v3928_v63, %v3779_v49 }
 0x3b5   : > { %v2115_v5 = vmul.f32 %v2908_v51, %v4503_v33  ;;  %v2075_v13 = vadd.f32 %v2073_v8, %v1999_v56  ;;  %v4505_v15 = vrot.slane %v3928_v63, %v3781_v50  ;;  %v2311_v43 = vadd.f32 %v4172_v28, %v2235_v41 }
 0x3b6   : > { %v2131_v39 = vmul.f32 %v4096_v47, %v4504_v53  ;;  %v2099_v10 = vadd.f32 %v2097_v29, %v2023_v17  ;;  %v2100_v19 = vadd.f32 %v2098_v42, %v2024_v38  ;;  %v2116_v30 = vadd.f32 %v2114_v6, %v2040_v9 }
 0x3b7   : > { %v2132_v27 = vmul.f32 %v2908_v51, %v4505_v15  ;;  %v2117_v32 = vadd.f32 %v2115_v5, %v2041_v62  ;;  %v4506_v45 = vrot.slane %v3937_v36, %v3779_v49  ;;  %v4507_v21 = vrot.slane %v3937_v36, %v3781_v50 }
 0x3b8   : > { %v2133_v18 = vadd.f32 %v2131_v39, %v2057_v52  ;;  %v4508_v63 = vrot.slane %v3884_v57, %v3779_v49  ;;  %v4509_v54 = vrot.slane %v3884_v57, %v3781_v50  ;;  %v4510_v9 = vrot.slane %v3893_v46, %v3779_v49 }
 0x3b9   : > { %v2134_v4 = vadd.f32 %v2132_v27, %v2058_v40  ;;  %v2148_v1 = vmul.f32 %v4096_v47, %v4506_v45  ;;  %v2149_v16 = vmul.f32 %v2908_v51, %v4507_v21  ;;  %v2387_v47 = vadd.f32 %v4181_v25, %v2311_v43  ;;  %v4241_v29 = vpop.eup %2917  ;;  %v4524_v21 = vld [vmem:[#allocation7_spill] sm:$0xff] }
 0x3ba   : > { %v2173_v17 = vmul.f32 %v4101_v37, %v4508_v63  ;;  %v2174_v56 = vmul.f32 %v2910_v24, %v4509_v54  ;;  %v2190_v11 = vmul.f32 %v4101_v37, %v4510_v9  ;;  %v4511_v36 = vrot.slane %v3893_v46, %v3781_v50 }
 0x3bb   : > { %v2150_v61 = vadd.f32 %v2148_v1, %v2074_v35  ;;  %v4512_v38 = vrot.slane %v3904_v7, %v3779_v49  ;;  %v2151_v52 = vadd.f32 %v2149_v16, %v2075_v13  ;;  %2919 = vrcp.f32 %v2387_v47 }
 0x3bc   : > { %v2191_v51 = vmul.f32 %v2910_v24, %v4511_v36  ;;  %v2175_v57 = vadd.f32 %v2173_v17, %v2099_v10  ;;  %v2176_v31 = vadd.f32 %v2174_v56, %v2100_v19  ;;  %v2192_v40 = vadd.f32 %v2190_v11, %v2116_v30 }
 0x3bd   : > { %v2207_v62 = vmul.f32 %v4101_v37, %v4512_v38  ;;  %v4513_v8 = vrot.slane %v3904_v7, %v3781_v50  ;;  %v4514_v46 = vrot.slane %v3906_v23, %v3779_v49  ;;  %v4515_v42 = vrot.slane %v3906_v23, %v3781_v50 }
 0x3be   : > { %v2193_v22 = vadd.f32 %v2191_v51, %v2117_v32  ;;  %v4516_v6 = vrot.slane %v3948_v55, %v3779_v49  ;;  %v4517_v7 = vrot.slane %v3948_v55, %v3781_v50  ;;  %v4518_v13 = vrot.slane %v3950_v48, %v3779_v49 }
 0x3bf   : > { %v2208_v12 = vmul.f32 %v2910_v24, %v4513_v8  ;;  %v2209_v35 = vadd.f32 %v2207_v62, %v2133_v18  ;;  %v2224_v59 = vmul.f32 %v4101_v37, %v4514_v46  ;;  %v2225_v26 = vmul.f32 %v2910_v24, %v4515_v42 }
 0x3c0   : > { %v2249_v33 = vmul.f32 %v4103_v2, %v4516_v6  ;;  %v2250_v5 = vmul.f32 %v4167_v0, %v4517_v7  ;;  %v2266_v37 = vmul.f32 %v4103_v2, %v4518_v13  ;;  %v4519_v23 = vrot.slane %v3950_v48, %v3781_v50  ;;  %v4539_v7 = vld [vmem:[#allocation10_spill] sm:$0xff] }
 0x3c1   : > { %v2210_v41 = vadd.f32 %v2208_v12, %v2134_v4  ;;  %v4520_v53 = vrot.slane %v3961_v58, %v3779_v49  ;;  %v2226_v15 = vadd.f32 %v2224_v59, %v2150_v61  ;;  %v2227_v55 = vadd.f32 %v2225_v26, %v2151_v52  ;;  %v4533_v12 = vld [vmem:[#allocation8_spill] sm:$0xff] }
 0x3c2   : > { %v2267_v24 = vmul.f32 %v4167_v0, %v4519_v23  ;;  %v2251_v27 = vadd.f32 %v2249_v33, %v2175_v57  ;;  %v2252_v10 = vadd.f32 %v2250_v5, %v2176_v31  ;;  %v2268_v19 = vadd.f32 %v2266_v37, %v2192_v40 }
 0x3c3   : > { %v2283_v39 = vmul.f32 %v4103_v2, %v4520_v53  ;;  %v4521_v32 = vrot.slane %v3961_v58, %v3781_v50  ;;  %v4522_v18 = vrot.slane %v3963_v44, %v3779_v49  ;;  %v4523_v45 = vrot.slane %v3963_v44, %v3781_v50 }
 0x3c4   : > { %v2269_v30 = vadd.f32 %v2267_v24, %v2193_v22  ;;  %v4525_v16 = vrot.slane %v4524_v21, %v3779_v49  ;;  %v4526_v58 = vrot.slane %v4524_v21, %v3781_v50  ;;  %v4527_v56 = vrot.slane %v3982_v20, %v3779_v49 }
 0x3c5   : > { %v2284_v43 = vmul.f32 %v4167_v0, %v4521_v32  ;;  %v2285_v48 = vadd.f32 %v2283_v39, %v2209_v35  ;;  %v2300_v4 = vmul.f32 %v4103_v2, %v4522_v18  ;;  %v2301_v1 = vmul.f32 %v4167_v0, %v4523_v45  ;;  %v2920_v42 = vpop.eup %2919 }
 0x3c6   : > { %v2325_v63 = vmul.f32 %v4108_v60, %v4525_v16  ;;  %v2326_v17 = vmul.f32 %v4172_v28, %v4526_v58  ;;  %v2342_v2 = vmul.f32 %v4108_v60, %v4527_v56  ;;  %v4528_v44 = vrot.slane %v3982_v20, %v3781_v50 }
 0x3c7   : > { %v2286_v54 = vadd.f32 %v2284_v43, %v2210_v41  ;;  %v4529_v9 = vrot.slane %v4012_v3, %v3779_v49  ;;  %v2302_v47 = vadd.f32 %v2300_v4, %v2226_v15  ;;  %v2303_v61 = vadd.f32 %v2301_v1, %v2227_v55 }
 0x3c8   : > { %v2343_v0 = vmul.f32 %v4172_v28, %v4528_v44  ;;  %v2327_v36 = vadd.f32 %v2325_v63, %v2251_v27  ;;  %v2328_v51 = vadd.f32 %v2326_v17, %v2252_v10  ;;  %v2344_v38 = vadd.f32 %v2342_v2, %v2268_v19  ;;  %v4542_v10 = vld [vmem:[#allocation11_spill] sm:$0xff] }
 0x3c9   : > { %v2359_v11 = vmul.f32 %v4108_v60, %v4529_v9  ;;  %v4530_v52 = vrot.slane %v4012_v3, %v3781_v50  ;;  %v4531_v31 = vrot.slane %v4024_v14, %v3779_v49  ;;  %v4532_v22 = vrot.slane %v4024_v14, %v3781_v50 }
 0x3ca   : > { %v2345_v62 = vadd.f32 %v2343_v0, %v2269_v30  ;;  %v4534_v35 = vrot.slane %v4533_v12, %v3779_v49  ;;  %v4535_v3 = vrot.slane %v4533_v12, %v3781_v50  ;;  %v4540_v5 = vrot.slane %v4539_v7, %v3779_v49 }
 0x3cb   : > { %v2360_v20 = vmul.f32 %v4172_v28, %v4530_v52  ;;  %v2361_v57 = vadd.f32 %v2359_v11, %v2285_v48  ;;  %v2376_v40 = vmul.f32 %v4108_v60, %v4531_v31  ;;  %v2377_v8 = vmul.f32 %v4172_v28, %v4532_v22  ;;  %v4536_v60 = vld [vmem:[#allocation9_spill] sm:$0xff] }
 0x3cc   : > { %v2401_v46 = vmul.f32 %v4119_v34, %v4534_v35  ;;  %v2402_v59 = vmul.f32 %v4181_v25, %v4535_v3  ;;  %v4537_v6 = vrot.slane %v4536_v60, %v3779_v49  ;;  %v4538_v28 = vrot.slane %v4536_v60, %v3781_v50 }
 0x3cd   : > { %v2362_v26 = vadd.f32 %v2360_v20, %v2286_v54  ;;  %v2435_v41 = vmul.f32 %v4119_v34, %v4540_v5  ;;  %v2378_v13 = vadd.f32 %v2376_v40, %v2302_v47  ;;  %v2379_v37 = vadd.f32 %v2377_v8, %v2303_v61 }
 0x3ce   : > { %v2418_v14 = vmul.f32 %v4119_v34, %v4537_v6  ;;  %v2419_v33 = vmul.f32 %v4181_v25, %v4538_v28  ;;  %v2403_v23 = vadd.f32 %v2401_v46, %v2327_v36  ;;  %v2404_v24 = vadd.f32 %v2402_v59, %v2328_v51 }
 0x3cf   : > { %v4541_v15 = vrot.slane %v4539_v7, %v3781_v50  ;;  %v2437_v27 = vadd.f32 %v2435_v41, %v2361_v57  ;;  %v4543_v19 = vrot.slane %v4542_v10, %v3779_v49  ;;  %v4544_v32 = vrot.slane %v4542_v10, %v3781_v50 }
 0x3d0   : > { %v2420_v53 = vadd.f32 %v2418_v14, %v2344_v38  ;;  %v2421_v39 = vadd.f32 %v2419_v33, %v2345_v62  ;;  %v2460_v48 = vmul.f32 %v4241_v29, %v2403_v23  ;;  %v2461_v18 = vmul.f32 %v2920_v42, %v2404_v24 }
 0x3d1   : > { %v2436_v55 = vmul.f32 %v4181_v25, %v4541_v15  ;;  %v2452_v30 = vmul.f32 %v4119_v34, %v4543_v19  ;;  %v2453_v43 = vmul.f32 %v4181_v25, %v4544_v32  ;;  %v2474_v21 = vmul.f32 %v4241_v29, %v2437_v27 }
 0x3d2   : > { %v2464_v45 = vmul.f32 %v4241_v29, %v2420_v53  ;;  %v2465_v1 = vmul.f32 %v2920_v42, %v2421_v39  ;;  %2462 = vst [vmem:[%s321_s17] sm:$0xf] %v2460_v48  ;;  %2463 = vst [vmem:[%s321_s17 + $0x8] sm:$0xf] %v2461_v18 }
 0x3d3   : > { %v2438_v4 = vadd.f32 %v2436_v55, %v2362_v26  ;;  %v2454_v16 = vadd.f32 %v2452_v30, %v2378_v13  ;;  %v2455_v63 = vadd.f32 %v2453_v43, %v2379_v37  ;;  %2476 = vst [vmem:[%s321_s17 + $0x10] sm:$0xf] %v2474_v21 }
 0x3d4   : > { %v2468_v49 = vrot.slane %v2464_v45, 4  ;;  %v2469_v50 = vrot.slane %v2465_v1, 4 }
 0x3d5   : > { %v2475_v34 = vmul.f32 %v2920_v42, %v2438_v4  ;;  %v2478_v25 = vmul.f32 %v4241_v29, %v2454_v16  ;;  %v2479_v58 = vmul.f32 %v2920_v42, %v2455_v63 }
 0x3d6   : > { %2472 = vst [vmem:[%s321_s17] sm:$0xf0] %v2468_v49  ;;  %2473 = vst [vmem:[%s321_s17 + $0x8] sm:$0xf0] %v2469_v50 }
 0x3d7   : > { %2477 = vst [vmem:[%s321_s17 + $0x18] sm:$0xf] %v2475_v34  ;;  %v2482_v17 = vrot.slane %v2478_v25, 4  ;;  %v2483_v54 = vrot.slane %v2479_v58, 4 }
 0x3d9   : > { %2486 = vst [vmem:[%s321_s17 + $0x10] sm:$0xf0] %v2482_v17  ;;  %2487 = vst [vmem:[%s321_s17 + $0x18] sm:$0xf0] %v2483_v54 }
 0x3da   : > { %2935 = shalt.err (!%p2932_p5)
}
 0x3db   : > { %s2936_s24 = scalar_lea.hbm %s4357_s20, 512  ;;  %s2940_s25 = scalar_lea.hbm %s4417_s7, 1024 }
 0x3dc   : > { %p2937_p6 = scmp.ne.s32.totalorder %s4357_s20, %s2936_s24  ;;  %p2941_p10 = scmp.lt.u32.totalorder %s4357_s20, %s4417_s7 }
 0x3dd   : > { %p2942_p11 = scmp.lt.u32.totalorder %s2940_s25, %s2936_s24  ;;  %p2944_p13 = scmp.lt.u32.totalorder %s2936_s24, %s4357_s20 }
 0x3de   : > { %p2938_p7 = pnand %p2937_p6, %p3101_p4 }
 0x3df   : > { %p2943_p12 = por %p2942_p11, %p2941_p10 }
 0x3e0   : > { %p2939_p9 = pneg %p2938_p7 }
 0x3e1   : > { %p2945_p0 = por %p2944_p13, %p2943_p12 }
 0x3e3   : > { %p2946_p1 = pnand %p2945_p0, %p2939_p9 }
 0x3e5   : > { %2949 = shalt.err (!%p2946_p1)
}
 0x3e6   : > { %s3017_s16 = smov 256   ;;  %s4545_s18 = smov 16  }
 0x3e7   : > { %2755 = dma.vmem_to_hbm [thread:$0]  (%p3101_p4), %s4359_s21, 512, %s4357_s20, %s4363_s29, %s3017_s16, %s3017_s16, %s4545_s18  }
 0x3e8 PF: > { %p2761_p2 = scmp.ge.s32.totalorder %s3000_s8, 2  ;;  %s2519_s22 = sand.u32 1, %s2980_s26  }
 0x3e9   : > { %s2520_s4 = scalar_lea.sflag [#allocation5], %s2519_s22 }
 0x3ea   : > { %p2758_p3 = pnand %p2761_p2, %p3108_p8 }
 0x3ec   : > { %2975 = dma.done.wait (!%p2758_p3), %s2520_s4, 512  }
 0x3ed   : > { %2977 = vsyncadd (!%p2758_p3), %s2520_s4, 4294966784  ;;  %s21_s8 = sadd.s32 1, %s3000_s8   ;;  %s4546_s26 = smov %s2984_s27 }
 0x3ee   : > { %p18_p5 = scmp.ge.s32.totalorder %s21_s8, 4   ;;  %s4547_s27 = smov %s2988_s28 }
 0x3ef   : > { %s4548_s28 = smov %s3114_s15  ;;  %s4549_s29 = smov %s2996_s30 }
 0x3f0   : > { %s4550_s30 = smov %s4552_s10  ;;  %20 = sbr.rel (!%p18_p5) target bundleno = 6 (0x6), region = 121 }
 0x3f7   :  { %2525 = vsyncpa [#allocation5], 1 }
 0x3f8   :  { %2527 = vsyncpa [#allocation5 + $0x1], 1 }

</bundles_post_ra>
